<compile_context>
chip_gen: v6e
topology: v6e:2x2x1
jax: 0.10.0
libtpu: 0.0.40
codegen_flags: <defaults>
</compile_context>

<pallas_src>
import functools
import math

import numpy as np
import jax
import jax.numpy as jnp
from jax.experimental import pallas as pl
from jax.experimental.pallas import tpu as pltpu


def _round_up(x, m):
    return (x + m - 1) // m * m


def _unfold_nchw(x, k, padding):
    """nn.Unfold((k, k), padding=p) for NCHW input. Returns (B, C*k*k, L), Ho, Wo."""
    B, C, H, W = x.shape
    if padding:
        x = jnp.pad(x, ((0, 0), (0, 0), (padding, padding), (padding, padding)))
    Ho = H + 2 * padding - k + 1
    Wo = W + 2 * padding - k + 1
    cols = []
    for ki in range(k):          # same (c, ki, kj) ordering as torch.nn.Unfold
        for kj in range(k):
            cols.append(x[:, :, ki:ki + Ho, kj:kj + Wo])
    patches = jnp.stack(cols, axis=2)                 # (B, C, k*k, Ho, Wo)
    return patches.reshape(B, C * k * k, Ho * Wo), Ho, Wo


def _srn_kernel(y_ref, s_ref, out_ref, *, num_out, p_dim, inv_dm1, inv_d,
                normalize, exponent):
    # y_ref:   (D, Nt)      im2col patch columns; lane axis = flattened (batch, loc)
    # s_ref:   (2*O*P, D)   rows [0, O*P)    : M = (X^T X)^-1 X^T   (per filter, stacked)
    #                       rows [O*P, 2O*P) : A = (X^T X) M - 2 X^T
    # out_ref: (O, Nt)
    y = y_ref[...].astype(jnp.float32)                       # (D, Nt)

    if normalize:
        # torch.std(y, dim=1): unbiased (ddof=1) std over the patch dimension;
        # the original divides y by it without mean-centering y itself.
        mean = jnp.mean(y, axis=0, keepdims=True)
        var = jnp.sum((y - mean) ** 2, axis=0, keepdims=True) * inv_dm1
        # rsqrt -> EUP slot; tiny floor guards zero-variance (padded) columns.
        y = y * jax.lax.rsqrt(jnp.maximum(var, 1e-30))

    sum_sq = jnp.sum(y * y, axis=0, keepdims=True)           # (1, Nt) = ||y||^2

    # One stacked matmul feeds W = M y and A y for every filter at once.
    z = jnp.dot(s_ref[...], y.astype(s_ref.dtype),
                preferred_element_type=jnp.float32)           # (2*O*P, Nt) f32
    op = num_out * p_dim
    w = z[:op].reshape(num_out, p_dim, -1)                    # (O, P, Nt)
    ay = z[op:].reshape(num_out, p_dim, -1)                   # (O, P, Nt)

    # mean_d (y - X W)^2 = (||y||^2 - 2 W.(X^T y) + W.(G W)) / D = (||y||^2 + W.(A y)) / D
    err = (sum_sq + jnp.sum(w * ay, axis=1)) * inv_d          # (O, Nt)

    if exponent:
        e1 = float(np.exp(-1.0))
        scale = 1.0 / (1.0 - e1)
        out = (jnp.exp(-err) - e1) * scale - 0.5
    elif normalize:
        out = 1.0 - err
    else:
        out = -err
    out_ref[...] = out.astype(out_ref.dtype)


def srn_layer_forward(x, weights, *, padding=0, epsilon=1e-4, num_slices=2,
                      degree=4, exponent=True, normalize=True, noise_key=None,
                      matmul_dtype=jnp.bfloat16, lane_tile=None):
    """Forward pass of SRNLayer. x: (B, C_in, H, W); weights: (O, C_in, k, k, S)."""
    O, C_in, k, _, S = weights.shape
    assert S == num_slices

    # --- glue: im2col + additive Gaussian noise (torch.randn_like analogue) ---
    y, Ho, Wo = _unfold_nchw(x, k, padding)                   # (B, D, L)
    B, D, L = y.shape
    if noise_key is not None:
        y = y + epsilon * jax.random.normal(noise_key, y.shape, y.dtype)

    # --- glue: polynomial design matrix X = [1, w, w^2, ..., w^degree] ---------
    Xb = weights.reshape(O, D, S).astype(jnp.float32)
    parts = [Xb] + [Xb ** (i + 2) for i in range(degree - 1)]
    X = jnp.concatenate(parts, axis=2)
    X = jnp.concatenate([jnp.ones((O, D, 1), X.dtype), X], axis=2)   # (O, D, P)
    P = X.shape[2]

    # TODO(synk): torch.linalg.inv has no Pallas TPU equivalent; the tiny per-filter
    # (P x P) normal-equation inverse stays in plain JAX (kept as an explicit inverse
    # to match the torch code, even though it can be poorly conditioned at degree 4).
    G = jnp.einsum('odp,odq->opq', X, X)                      # X^T X         (O, P, P)
    M = jnp.einsum('opq,odq->opd', jnp.linalg.inv(G), X)      # (X^T X)^-1 X^T (O, P, D)
    # A y = G W - 2 X^T y  =>  mean_d (y - X W)^2 = (||y||^2 + W . (A y)) / D.
    A = jnp.einsum('opq,oqd->opd', G, M) - 2.0 * jnp.swapaxes(X, 1, 2)  # (O, P, D)
    Smat = jnp.concatenate([M.reshape(O * P, D), A.reshape(O * P, D)], axis=0)

    # --- lane-dense layout: flatten (B, L) into one padded, 128-aligned lane axis ---
    total = B * L
    if lane_tile is None:
        # Multiple of 128; big enough to amortize the ~0.35us/step overhead, and at
        # MNIST scale it still yields >= 2 parallel grid steps (v7x: feed both TCs).
        lane_tile = 2048 if total >= 4096 else (512 if total >= 1024 else 256)
    n_pad = _round_up(total, lane_tile)
    y_flat = jnp.transpose(y, (1, 0, 2)).reshape(D, total)    # (D, B*L)
    y_flat = jnp.pad(y_flat, ((0, 0), (0, n_pad - total)))
    grid = (n_pad // lane_tile,)

    kernel = functools.partial(
        _srn_kernel, num_out=O, p_dim=P,
        inv_dm1=1.0 / (D - 1), inv_d=1.0 / D,
        normalize=normalize, exponent=exponent)

    item = jnp.dtype(matmul_dtype).itemsize
    flops = int(2 * (2 * O * P) * D * n_pad + 8 * D * n_pad + 3 * O * P * n_pad)
    transcendentals = int((O + 1) * n_pad)                    # exp epilogue + rsqrt
    bytes_accessed = int((D * n_pad + 2 * O * P * D) * item + O * n_pad * 4)

    out_flat = pl.pallas_call(
        kernel,
        out_shape=jax.ShapeDtypeStruct((O, n_pad), jnp.float32),
        grid_spec=pltpu.PrefetchScalarGridSpec(
            num_scalar_prefetch=0,
            grid=grid,
            in_specs=[
                pl.BlockSpec((D, lane_tile), lambda n: (0, n)),
                # Grid-constant projector stack: constant block index, so Pallas
                # skips re-DMA between consecutive steps. ~10 KB, VMEM is a non-issue.
                pl.BlockSpec((2 * O * P, D), lambda n: (0, 0)),
            ],
            out_specs=pl.BlockSpec((O, lane_tile), lambda n: (0, n)),
        ),
        compiler_params=pltpu.CompilerParams(
            dimension_semantics=("parallel",)),
        cost_estimate=pl.CostEstimate(
            flops=flops, transcendentals=transcendentals,
            bytes_accessed=bytes_accessed),
    )(y_flat.astype(matmul_dtype), Smat.astype(matmul_dtype))

    # err.view(B, O, sqrt(L), sqrt(L)) in the torch code (here already mapped through
    # the exp/normalize epilogue inside the kernel).
    out = out_flat[:, :total].reshape(O, B, L)
    out = jnp.transpose(out, (1, 0, 2)).reshape(B, O, Ho, Wo)
    return out


if __name__ == "__main__":
    key = jax.random.PRNGKey(0)
    kw, kx, kn = jax.random.split(key, 3)

    # Small shapes consistent with the module.
    B, C_in, H, W_sp = 2, 4, 16, 16
    O, ksz, S, degree, padding = 8, 3, 2, 4, 0
    epsilon = 1e-4

    # Deterministic kaiming_uniform_-style init for weights (O, C_in, k, k, S).
    fan_in = C_in * ksz * ksz * S
    bound = math.sqrt(2.0) * math.sqrt(3.0 / fan_in)
    weights = jax.random.uniform(kw, (O, C_in, ksz, ksz, S),
                                 jnp.float32, -bound, bound)

    x = jax.random.normal(kx, (B, C_in, H, W_sp), jnp.float32)

    out = srn_layer_forward(x, weights, padding=padding, epsilon=epsilon,
                            num_slices=S, degree=degree,
                            exponent=True, normalize=True, noise_key=kn)
    jax.block_until_ready(out)

    Ho = H + 2 * padding - ksz + 1
    assert out.shape == (B, O, Ho, Ho), out.shape
    assert bool(jnp.all(jnp.isfinite(out)))
    print("KERNEL_OK")
</pallas_src>

<mosaic_0001>
module attributes {stable_mosaic.version = 11 : i64} {
  func.func @_srn_kernel(%arg0: i32, %arg1: memref<36x256xbf16, #tpu.memory_space<vmem>>, %arg2: memref<144x36xbf16, #tpu.memory_space<vmem>>, %arg3: memref<8x256xf32, #tpu.memory_space<vmem>>) attributes {dimension_semantics = [#tpu.dimension_semantics<parallel>], iteration_bounds = array<i64: 2>, scalar_prefetch = 0 : i64, scratch_operands = 0 : i64, tpu.core_type = #tpu.core_type<tc>, window_params = [{transform_indices = @transform_0, window_bounds = array<i64: 36, 256>}, {pipeline_mode = #tpu.pipeline_mode<synchronous>, transform_indices = @transform_1, window_bounds = array<i64: 144, 36>}, {transform_indices = @transform_2, window_bounds = array<i64: 8, 256>}]} {
    %c0 = arith.constant 0 : index
    %c0_0 = arith.constant 0 : index
    %0 = vector.load %arg1[%c0, %c0_0] : memref<36x256xbf16, #tpu.memory_space<vmem>>, vector<36x256xbf16>
    %1 = arith.extf %0 : vector<36x256xbf16> to vector<36x256xf32>
    %cst = arith.constant dense<0.000000e+00> : vector<256xf32>
    %2 = vector.multi_reduction <add>, %1, %cst [0] : vector<36x256xf32> to vector<256xf32>
    %3 = vector.shape_cast %2 : vector<256xf32> to vector<1x256xf32>
    %cst_1 = arith.constant 3.600000e+01 : f32
    %4 = vector.broadcast %cst_1 : f32 to vector<1x256xf32>
    %5 = arith.divf %3, %4 : vector<1x256xf32>
    %6 = vector.broadcast %5 : vector<1x256xf32> to vector<36x256xf32>
    %7 = arith.subf %1, %6 : vector<36x256xf32>
    %8 = arith.mulf %7, %7 : vector<36x256xf32>
    %cst_2 = arith.constant dense<0.000000e+00> : vector<256xf32>
    %9 = vector.multi_reduction <add>, %8, %cst_2 [0] : vector<36x256xf32> to vector<256xf32>
    %10 = vector.shape_cast %9 : vector<256xf32> to vector<1x256xf32>
    %cst_3 = arith.constant 0.0285714287 : f32
    %11 = vector.broadcast %cst_3 : f32 to vector<1x256xf32>
    %12 = arith.mulf %10, %11 : vector<1x256xf32>
    %cst_4 = arith.constant 1.000000e-30 : f32
    %13 = vector.broadcast %cst_4 : f32 to vector<1x256xf32>
    %14 = arith.maximumf %12, %13 : vector<1x256xf32>
    %15 = math.rsqrt %14 : vector<1x256xf32>
    %16 = vector.broadcast %15 : vector<1x256xf32> to vector<36x256xf32>
    %17 = arith.mulf %1, %16 : vector<36x256xf32>
    %18 = arith.mulf %17, %17 : vector<36x256xf32>
    %cst_5 = arith.constant dense<0.000000e+00> : vector<256xf32>
    %19 = vector.multi_reduction <add>, %18, %cst_5 [0] : vector<36x256xf32> to vector<256xf32>
    %20 = vector.shape_cast %19 : vector<256xf32> to vector<1x256xf32>
    %c0_6 = arith.constant 0 : index
    %c0_7 = arith.constant 0 : index
    %21 = vector.load %arg2[%c0_6, %c0_7] : memref<144x36xbf16, #tpu.memory_space<vmem>>, vector<144x36xbf16>
    %22 = arith.truncf %17 : vector<36x256xf32> to vector<36x256xbf16>
    %cst_8 = arith.constant dense<0.000000e+00> : vector<144x256xf32>
    %23 = tpu.matmul %21, %22, %cst_8 {dimension_numbers = #tpu.dot_dimension_numbers<[1], [0], [0], [1], [0, 0, 1, 1], [], []>} : vector<144x36xbf16>, vector<36x256xbf16>, vector<144x256xf32> -> vector<144x256xf32>
    %24 = vector.extract_strided_slice %23 {offsets = [0, 0], sizes = [72, 256], strides = [1, 1]} : vector<144x256xf32> to vector<72x256xf32>
    %25 = vector.shape_cast %24 : vector<72x256xf32> to vector<8x9x256xf32>
    %26 = vector.extract_strided_slice %23 {offsets = [72, 0], sizes = [72, 256], strides = [1, 1]} : vector<144x256xf32> to vector<72x256xf32>
    %27 = vector.shape_cast %26 : vector<72x256xf32> to vector<8x9x256xf32>
    %28 = arith.mulf %25, %27 : vector<8x9x256xf32>
    %cst_9 = arith.constant dense<0.000000e+00> : vector<8x256xf32>
    %29 = vector.multi_reduction <add>, %28, %cst_9 [1] : vector<8x9x256xf32> to vector<8x256xf32>
    %30 = vector.broadcast %20 : vector<1x256xf32> to vector<8x256xf32>
    %31 = arith.addf %30, %29 : vector<8x256xf32>
    %cst_10 = arith.constant 0.027777778 : f32
    %32 = vector.broadcast %cst_10 : f32 to vector<8x256xf32>
    %33 = arith.mulf %31, %32 : vector<8x256xf32>
    %cst_11 = arith.constant 0.000000e+00 : f32
    %34 = vector.broadcast %cst_11 : f32 to vector<8x256xf32>
    %35 = arith.subf %34, %33 : vector<8x256xf32>
    %36 = math.exp %35 : vector<8x256xf32>
    %cst_12 = arith.constant 0.36787945 : f32
    %37 = vector.broadcast %cst_12 : f32 to vector<8x256xf32>
    %38 = arith.subf %36, %37 : vector<8x256xf32>
    %cst_13 = arith.constant 1.58197665 : f32
    %39 = vector.broadcast %cst_13 : f32 to vector<8x256xf32>
    %40 = arith.mulf %38, %39 : vector<8x256xf32>
    %cst_14 = arith.constant 5.000000e-01 : f32
    %41 = vector.broadcast %cst_14 : f32 to vector<8x256xf32>
    %42 = arith.subf %40, %41 : vector<8x256xf32>
    %c0_15 = arith.constant 0 : index
    %c0_16 = arith.constant 0 : index
    %43 = vector.load %arg3[%c0_15, %c0_16] : memref<8x256xf32, #tpu.memory_space<vmem>>, vector<8x256xf32>
    tpu.vector_store %arg3[%c0_15, %c0_16], %42 {strides = array<i32>} : memref<8x256xf32, #tpu.memory_space<vmem>>, vector<8x256xf32>,
    return
  }
  func.func @transform_0(%arg0: i32) -> (i32, i32) {
    %c0_i32 = arith.constant 0 : i32
    %c0_i32_0 = arith.constant 0 : i32
    return %c0_i32, %arg0 : i32, i32
  }
  func.func @transform_1(%arg0: i32) -> (i32, i32) {
    %c0_i32 = arith.constant 0 : i32
    %c0_i32_0 = arith.constant 0 : i32
    %c0_i32_1 = arith.constant 0 : i32
    return %c0_i32, %c0_i32_0 : i32, i32
  }
  func.func @transform_2(%arg0: i32) -> (i32, i32) {
    %c0_i32 = arith.constant 0 : i32
    %c0_i32_0 = arith.constant 0 : i32
    return %c0_i32, %arg0 : i32, i32
  }
}

</mosaic_0001>

<bundles_post_ra>
// kernel: tpu_custom_call.1
= control target key start
LH: loop header
LB: loop body
LE: loop exit
PB: predicated region body
PF: predicated region fallthrough
CT: control target
= control target key end

     0   :  { %7 = vsyncpa [#allocation4], 0  ;;  %s3634_s0 = inlined_call_operand.vmem [shape: bf16[36,512], index: 0, kind: input, shape index: {}]   ;;  %s3635_s1 = inlined_call_operand.vmem [shape: bf16[144,36], index: 1, kind: input, shape index: {}]   ;;  %s3636_s2 = inlined_call_operand.hbm [shape: f32[8,512], index: 2, kind: output, shape index: {}]  }
   0x1   :  { %9 = vsyncpa [#allocation4 + $0x1], 0  ;;  %s2964_s9 = smov 0   ;;  %s2966_s10 = smov 0  }
   0x2   :  { %s2968_s11 = smov 0   ;;  %s2970_s12 = smov 0  }
   0x3 LB: > { %s2780_s13 = sadd.s32 4294967295, %s2944_s12   ;;  %s2781_s14 = sadd.s32 4294967294, %s2944_s12   ;;  %s2944_s12 = sphi %s2970_s12, %s3646_s12   ;;  %s2940_s11 = sphi %s2968_s11, %s3645_s11   ;;  %s2936_s10 = sphi %s2966_s10, %s3644_s10   ;;  %s2932_s9 = sphi %s2964_s9, %s3643_s9  }
   0x4   : > { %s2987_s15 = sadd.s32 1, %s2944_s12   ;;  %s22_s16 = sadd.s32 1, %s2940_s11 }
   0x5   : > { %s19_s17 = ssub.s32 %s2944_s12, %s2987_s15  ;;  %p29_p0 = scmp.ne.s32.totalorder %s2940_s11, %s2936_s10 }
   0x6   : > { %p20_p1 = scmp.eq.s32.totalorder %s19_s17, 0  ;;  %p30_p2 = scmp.eq.s32.totalorder %s2944_s12, 0 }
   0x7   : > { %p80_p3 = scmp.eq.s32.totalorder %s2780_s13, 1  ;;  %p85_p4 = scmp.ne.s32.totalorder %s2936_s10, %s2932_s9 }
   0x8   : > { %s3000_s18 = scalar_select %p20_p1, %s2940_s11, %s22_s16  }
   0x9   : > { %p31_p5 = por %p30_p2, %p29_p0  ;;  %p3002_p6 = por %p80_p3, %p29_p0 }
   0xa   : > { %p86_p7 = scmp.eq.s32.totalorder %s2781_s14, 1  ;;  %p2783_p9 = scmp.ge.s32.totalorder %s2944_s12, 2 }
   0xc   : > { %p3006_p8 = por %p86_p7, %p85_p4  ;;  %105 = sbr.rel (%p2783_p9) target bundleno = 24 (0x18), region = 20 }
  0x11   : > { %108 = sbr.rel (!%p31_p5) target bundleno = 24 (0x18), region = 24  ;;  %s110_s21 = sand.u32 (%p31_p5), 1, %s2940_s11  }
  0x12   : > { %s2816_s22 = sshll.u32 (%p31_p5), %s2944_s12, 3  ;;  %s2824_s23 = smul.u32 (%p31_p5), 40, %s110_s21 }
  0x13   : > { %s115_s26 = scalar_lea.vmem (%p31_p5), %s3634_s0, %s2816_s22 }
  0x14   : > { %v152_v0 = vld [vmem:[%s115_s26] sm:$0xff] (%p31_p5)  ;;  %v154_v1 = vld [vmem:[%s115_s26 + $0x10] sm:$0xff] (%p31_p5)  ;;  %s112_s27 = scalar_lea.vmem (%p31_p5), [#allocation2], %s2824_s23 }
  0x15   : > { %v156_v2 = vld [vmem:[%s115_s26 + $0x20] sm:$0xff] (%p31_p5)  ;;  %v158_v3 = vld [vmem:[%s115_s26 + $0x30] sm:$0xff] (%p31_p5)  ;;  %153 = vst [vmem:[%s112_s27] sm:$0xff] (%p31_p5), %v152_v0  ;;  %155 = vst [vmem:[%s112_s27 + $0x8] sm:$0xff] (%p31_p5), %v154_v1 }
  0x16   : > { %v160_v4 = vld [vmem:[%s115_s26 + $0x40] sm:$0xff]  ;;  %157 = vst [vmem:[%s112_s27 + $0x10] sm:$0xff] %v156_v2  ;;  %159 = vst [vmem:[%s112_s27 + $0x18] sm:$0xff] %v158_v3 }
  0x17   : > { %161 = vst [vmem:[%s112_s27 + $0x20] sm:$0xff] %v160_v4 }
  0x18 PF: > { %p2786_p10 = scmp.ge.s32.totalorder %s2944_s12, 1  ;;  %p166_p11 = scmp.lt.s32.totalorder %s2944_s12, 3 }
  0x1a   : > { %p167_p12 = pnand %p2786_p10, %p166_p11 }
  0x1b   : > { %s3021_s28 = sand.u32 (!%p167_p12), 1, %s2936_s10   ;;  %s2817_s4 = sshll.u32 (!%p167_p12), %s2780_s13, 8 }
  0x1c   : > { %170 = sbr.rel (%p167_p12) target bundleno = 524 (0x20c), region = 62  ;;  %s2787_s3 = sshll.u32 (!%p167_p12), %s3021_s28, 4 }
  0x1d   : > { %s2825_s29 = smul.u32 (!%p167_p12), 40, %s3021_s28  ;;  %s193_s5 = scalar_lea.vmem (!%p167_p12), [#allocation3], %s2787_s3 }
  0x1e   : > { %s2716_s6 = sshll.u32 (!%p167_p12), %s193_s5, 4  ;;  %s3597_s14 = scalar_lea.hbm (!%p167_p12), %s3636_s2, %s2817_s4  ;;  %s2717_s6 = int_to_ptr.vmem [resolvable:$true] %s2716_s6 }
  0x1f   : > { %s175_s30 = scalar_lea.vmem (!%p167_p12), [#allocation2], %s2825_s29  ;;  %s2702_s16 = scalar_lea.sflag (!%p167_p12), [#allocation4], %s3021_s28 }
  0x20   : > { %s2884_s17 = scalar_lea.vmem (!%p167_p12), %s2717_s6, 256  ;;  %s2948_s13 = smov (!%p167_p12), [#allocation3]  }
  0x21   : > { %v2946_v5 = vmov 0   ;;  %v197_v6 = vld [vmem:[%s175_s30] sm:$0xff]  ;;  %v198_v7 = vld [vmem:[%s175_s30 + $0x8] sm:$0xff]  ;;  %v199_v8 = vld [vmem:[%s175_s30 + $0x10] sm:$0xff]  ;;  %vm215_vm0 = vcmask 1043456   ;;  %vm425_vm1 = vcmask 1041408   ;;  %p2885_p13 = scmp.ne.s32.totalorder %s2717_s6, %s2884_s17 }
  0x22   : > { %464 = vmatprep.mubr.bf16.mxu0 %v2946_v5  ;;  %514 = vmatprep.mubr.bf16.mxu1 %v2946_v5  ;;  %v200_v9 = vld [vmem:[%s175_s30 + $0x18] sm:$0xff]  ;;  %v201_v10 = vld [vmem:[%s175_s30 + $0x20] sm:$0x33]  ;;  %v3026_v11 = vunpack.c.l.bf16 %v197_v6  ;;  %v3028_v12 = vunpack.c.h.bf16 %v197_v6  ;;  %v3030_v13 = vunpack.c.l.bf16 %v198_v7  ;;  %v3032_v14 = vunpack.c.h.bf16 %v198_v7  ;;  %s2888_s21 = sshll.u32 %s2948_s13, 4  ;;  %s2889_s21 = int_to_ptr.vmem [resolvable:$false] %s2888_s21 }
  0x23   : > { %v3034_v15 = vunpack.c.l.bf16 %v199_v8  ;;  %v3036_v16 = vunpack.c.h.bf16 %v199_v8  ;;  %v3038_v17 = vunpack.c.h.bf16 %v200_v9  ;;  %v3040_v18 = vunpack.c.h.bf16 %v201_v10  ;;  %p2886_p0 = pnand %p2885_p13, %p3002_p6  ;;  %s2890_s22 = scalar_lea.vmem %s2889_s21, 512 }
  0x24   : > { %v224_v19 = vadd.f32 %v3032_v14, %v3028_v12  ;;  %v3044_v20 = vunpack.c.l.bf16 %v200_v9  ;;  %v3046_v21 = vunpack.c.l.bf16 %v201_v10  ;;  %v212_v22 = vadd.f32 %v3030_v13, %v3026_v11  ;;  %p2891_p2 = scmp.lt.s32.totalorder %s2717_s6, %s2889_s21  ;;  %p2892_p3 = scmp.lt.s32.totalorder %s2890_s22, %s2884_s17 }
  0x25   : > { %v227_v25 = vsel %vm215_vm0, %v3040_v18, 0.0  ;;  %vm397_vm2 = vcmask 293888   ;;  %vm2515_vm3 = vcmask 1040384   ;;  %vm2660_vm4 = vcmask 1041409   ;;  %p2887_p1 = pneg %p2886_p0 }
  0x26   : > { %v225_v23 = vadd.f32 %v224_v19, %v3036_v16  ;;  %v213_v24 = vadd.f32 %v212_v22, %v3034_v15  ;;  %v216_v26 = vsel %vm215_vm0, %v3046_v21, 0.0  ;;  %vm2662_vm5 = vcmask 1042434   ;;  %p2893_p4 = por %p2892_p3, %p2891_p2 }
  0x27   : > { %vm2664_vm6 = vcmask 1043459   ;;  %vm2666_vm7 = vcmask 1044484   ;;  %vm2668_vm8 = vcmask 1045509   ;;  %vm2670_vm9 = vcmask 1046534  }
  0x28   : > { %v226_v27 = vadd.f32 %v225_v23, %v3038_v17  ;;  %v214_v28 = vadd.f32 %v213_v24, %v3044_v20  ;;  %vm2672_vm10 = vcmask 1047559   ;;  %p2894_p5 = pnand %p2893_p4, %p2887_p1 }
  0x2a   : > { %v228_v29 = vadd.f32 %v227_v25, %v226_v27  ;;  %v217_v30 = vadd.f32 %v216_v26, %v214_v28 }
  0x2c   : > { %v229_v31 = vrot.slane %v228_v29, 4  ;;  %v218_v32 = vrot.slane %v217_v30, 4 }
  0x2e   : > { %v230_v33 = vadd.f32 %v229_v31, %v228_v29  ;;  %v219_v34 = vadd.f32 %v218_v32, %v217_v30 }
  0x30   : > { %v231_v35 = vrot.slane %v230_v33, 2  ;;  %v220_v36 = vrot.slane %v219_v34, 2 }
  0x32   : > { %v232_v37 = vadd.f32 %v231_v35, %v230_v33  ;;  %v221_v38 = vadd.f32 %v220_v36, %v219_v34 }
  0x34   : > { %v233_v39 = vrot.slane %v232_v37, 1  ;;  %v222_v40 = vrot.slane %v221_v38, 1 }
  0x36   : > { %v234_v41 = vadd.f32 %v233_v39, %v232_v37  ;;  %v223_v42 = vadd.f32 %v222_v40, %v221_v38 }
  0x38   : > { %v237_v43 = vmul.f32 0.027777778, %v234_v41  ;;  %v236_v44 = vmul.f32 0.027777778, %v223_v42 }
  0x3a   : > { %v239_v45 = vsub.f32 %v3028_v12, %v237_v43  ;;  %v241_v46 = vsub.f32 %v3032_v14, %v237_v43  ;;  %v243_v47 = vsub.f32 %v3036_v16, %v237_v43  ;;  %v245_v48 = vsub.f32 %v3038_v17, %v237_v43 }
  0x3b   : > { %v247_v49 = vsub.f32 %v3040_v18, %v237_v43  ;;  %v238_v50 = vsub.f32 %v3026_v11, %v236_v44  ;;  %v240_v51 = vsub.f32 %v3030_v13, %v236_v44  ;;  %v242_v52 = vsub.f32 %v3034_v15, %v236_v44 }
  0x3c   : > { %v249_v53 = vmul.f32 %v239_v45, %v239_v45  ;;  %v251_v54 = vmul.f32 %v241_v46, %v241_v46  ;;  %v253_v55 = vmul.f32 %v243_v47, %v243_v47  ;;  %v244_v57 = vsub.f32 %v3044_v20, %v236_v44 }
  0x3d   : > { %v257_v56 = vmul.f32 %v247_v49, %v247_v49  ;;  %v246_v58 = vsub.f32 %v3046_v21, %v236_v44  ;;  %v248_v59 = vmul.f32 %v238_v50, %v238_v50  ;;  %v255_v60 = vmul.f32 %v245_v48, %v245_v48 }
  0x3e   : > { %v269_v61 = vadd.f32 %v251_v54, %v249_v53  ;;  %v250_v62 = vmul.f32 %v240_v51, %v240_v51  ;;  %v252_v63 = vmul.f32 %v242_v52, %v242_v52  ;;  %v254_v2 = vmul.f32 %v244_v57, %v244_v57 }
  0x3f   : > { %v256_v0 = vmul.f32 %v246_v58, %v246_v58  ;;  %v272_v4 = vsel %vm215_vm0, %v257_v56, 0.0 }
  0x40   : > { %v270_v1 = vadd.f32 %v269_v61, %v253_v55  ;;  %v258_v3 = vadd.f32 %v250_v62, %v248_v59 }
  0x41   : > { %v261_v8 = vsel %vm215_vm0, %v256_v0, 0.0 }
  0x42   : > { %v271_v6 = vadd.f32 %v270_v1, %v255_v60  ;;  %v259_v7 = vadd.f32 %v258_v3, %v252_v63  ;;  %v2867_v1 = vld [vmem:[%s3635_s1] sm:$0xff]  }
  0x44   : > { %v273_v9 = vadd.f32 %v272_v4, %v271_v6  ;;  %v260_v10 = vadd.f32 %v259_v7, %v254_v2  ;;  %v2868_v2 = vld [vmem:[%s3635_s1 + $0x28] sm:$0xff]   ;;  %v2870_v7 = vld [vmem:[%s3635_s1 + $0x30] sm:$0xff]  }
  0x45   : > { %v2869_v6 = vld [vmem:[%s3635_s1 + $0x8] sm:$0xff]  }
  0x46   : > { %v274_v19 = vrot.slane %v273_v9, 4  ;;  %v262_v22 = vadd.f32 %v261_v8, %v260_v10  ;;  %v2871_v8 = vld [vmem:[%s3635_s1 + $0x10] sm:$0xff]   ;;  %v2873_v10 = vld [vmem:[%s3635_s1 + $0x18] sm:$0xff]  }
  0x48   : > { %v275_v23 = vadd.f32 %v274_v19, %v273_v9  ;;  %v263_v24 = vrot.slane %v262_v22, 4  ;;  %v2872_v9 = vld [vmem:[%s3635_s1 + $0x38] sm:$0xff]   ;;  %v2874_v19 = vld [vmem:[%s3635_s1 + $0x40] sm:$0xff]  }
  0x4a   : > { %v276_v25 = vrot.slane %v275_v23, 2  ;;  %v264_v26 = vadd.f32 %v263_v24, %v262_v22  ;;  %v2875_v22 = vld [vmem:[%s3635_s1 + $0x20] sm:$0xff]  }
  0x4c   : > { %v277_v27 = vadd.f32 %v276_v25, %v275_v23  ;;  %v265_v28 = vrot.slane %v264_v26, 2  ;;  %v2947_v23 = vmov 1966171168   ;;  %v578_v25 = vlaneseq }
  0x4d   : > { %v576_v24 = vunpack.c.l.s4 %v2947_v23 }
  0x4e   : > { %v278_v29 = vrot.slane %v277_v27, 1  ;;  %v266_v30 = vadd.f32 %v265_v28, %v264_v26 }
  0x4f   : > { %v577_v26 = vunpack.c.0.s8 %v576_v24 }
  0x50   : > { %v279_v31 = vadd.f32 %v278_v29, %v277_v27  ;;  %v267_v32 = vrot.slane %v266_v30, 1  ;;  %v579_v27 = vshrl.u32 %v578_v25, 7 }
  0x52   : > { %v281_v33 = vmul.f32 0.028571429, %v279_v31  ;;  %v268_v34 = vadd.f32 %v267_v32, %v266_v30  ;;  %v3133_v32 = vsub.s32 %v577_v26, %v579_v27 }
  0x54   : > { %v283_v35 = vmax.f32 %v281_v33, 1e-30  ;;  %v280_v36 = vmul.f32 0.028571429, %v268_v34 }
  0x56   : > { %2876 = vrsqrt.f32 %v283_v35  ;;  %v282_v37 = vmax.f32 %v280_v36, 1e-30 }
  0x58   : > { %2878 = vrsqrt.f32 %v282_v37 }
  0x63   : > { %v2877_v38 = vpop.eup %2876 }
  0x64   : > { %v295_v39 = vmul.f32 %v2877_v38, %v3040_v18  ;;  %v291_v40 = vmul.f32 %v2877_v38, %v3036_v16  ;;  %v293_v41 = vmul.f32 %v2877_v38, %v3038_v17  ;;  %v287_v45 = vmul.f32 %v2877_v38, %v3028_v12 }
  0x65   : > { %v2879_v42 = vpop.eup %2878  ;;  %v289_v49 = vmul.f32 %v2877_v38, %v3032_v14 }
  0x66   : > { %v351_v43 = vpack.c.bf16 %v295_v39, %v295_v39  ;;  %v294_v44 = vmul.f32 %v2879_v42, %v3046_v21  ;;  %v349_v46 = vpack.c.bf16 %v293_v41, %v291_v40  ;;  %v290_v47 = vmul.f32 %v2879_v42, %v3034_v15 }
  0x67   : > { %v292_v48 = vmul.f32 %v2879_v42, %v3044_v20  ;;  %v297_v16 = vmul.f32 %v287_v45, %v287_v45  ;;  %v301_v50 = vmul.f32 %v291_v40, %v291_v40  ;;  %v299_v17 = vmul.f32 %v289_v49, %v289_v49 }
  0x68   : > { %2797 = vmatprep.subr.msk.bf16.mxu0 %vm425_vm1, %v351_v43  ;;  %v350_v18 = vpack.c.bf16 %v294_v44, %v294_v44  ;;  %2818 = vmatprep.subr.msk.bf16.mxu1 %vm425_vm1, %v351_v43  ;;  %v305_v51 = vmul.f32 %v295_v39, %v295_v39  ;;  %v303_v53 = vmul.f32 %v293_v41, %v293_v41 }
  0x69   : > { %v286_v21 = vmul.f32 %v2879_v42, %v3026_v11  ;;  %v348_v12 = vpack.c.bf16 %v292_v48, %v290_v47  ;;  %v317_v54 = vadd.f32 %v299_v17, %v297_v16  ;;  %v288_v15 = vmul.f32 %v2879_v42, %v3030_v13 }
  0x6a   : > { %v427_v52 = vsel %vm425_vm1, %v350_v18, 0  ;;  %v347_v14 = vpack.c.bf16 %v289_v49, %v287_v45  ;;  %v300_v55 = vmul.f32 %v290_v47, %v290_v47  ;;  %v320_v58 = vsel %vm215_vm0, %v305_v51, 0.0 }
  0x6b   : > { %443 = vmatpush1.bf16.msra.mxu0 %v427_v52  ;;  %2821 = vmatpush1.bf16.msra.mxu1 %v427_v52  ;;  %v296_v20 = vmul.f32 %v286_v21, %v286_v21  ;;  %v318_v56 = vadd.f32 %v317_v54, %v301_v50  ;;  %v298_v57 = vmul.f32 %v288_v15, %v288_v15 }
  0x6c   : > { %444 = vmatprep.subr.bf16.mxu0 %v349_v46  ;;  %2819 = vmatprep.subr.bf16.mxu1 %v349_v46  ;;  %v304_v59 = vmul.f32 %v294_v44, %v294_v44  ;;  %v302_v60 = vmul.f32 %v292_v48, %v292_v48  ;;  %v346_v62 = vpack.c.bf16 %v288_v15, %v286_v21 }
  0x6d   : > { %v319_v61 = vadd.f32 %v318_v56, %v303_v53  ;;  %v306_v11 = vadd.f32 %v298_v57, %v296_v20 }
  0x6e   : > { %v309_v0 = vsel %vm215_vm0, %v304_v59, 0.0 }
  0x6f   : > { %445 = vmatpush1.bf16.msra.mxu0 %v348_v12  ;;  %2822 = vmatpush1.bf16.msra.mxu1 %v348_v12  ;;  %v3081_v63 = vadd.f32 %v320_v58, %v319_v61  ;;  %v307_v13 = vadd.f32 %v306_v11, %v300_v55 }
  0x70   : > { %446 = vmatprep.subr.bf16.mxu0 %v347_v14  ;;  %2820 = vmatprep.subr.bf16.mxu1 %v347_v14 }
  0x71   : > { %v308_v3 = vadd.f32 %v307_v13, %v302_v60 }
  0x73   : > { %447 = vmatpush1.bf16.msra.mxu0 %v346_v62  ;;  %2823 = vmatpush1.bf16.msra.mxu1 %v346_v62  ;;  %v3090_v4 = vadd.f32 %v309_v0, %v308_v3 }
  0x76   : > { %2798 = vmatmul.mubr.msk.bf16.vlgmr.msra.gmra.mxu0 %vm397_vm2, %v2867_v1  ;;  %2803 = vmatmul.mubr.msk.bf16.vlgmr.msra.gmra.mxu1 %vm397_vm2, %v2868_v2 }
  0x77   : > { %474 = vmatprep.mubr.bf16.mxu0 %v2946_v5  ;;  %524 = vmatprep.mubr.bf16.mxu1 %v2946_v5 }
  0x7e   : > { %2799 = vmatmul.mubr.msk.bf16.gmra.mxu0 %vm397_vm2, %v2869_v6  ;;  %2804 = vmatmul.mubr.msk.bf16.gmra.mxu1 %vm397_vm2, %v2870_v7 }
  0x7f   : > { %484 = vmatprep.mubr.bf16.mxu0 %v2946_v5  ;;  %534 = vmatprep.mubr.bf16.mxu1 %v2946_v5 }
  0x86   : > { %2800 = vmatmul.mubr.msk.bf16.gmra.mxu0 %vm397_vm2, %v2871_v8  ;;  %2805 = vmatmul.mubr.msk.bf16.gmra.mxu1 %vm397_vm2, %v2872_v9  ;;  %v322_v8 = vrot.slane %v3081_v63, 4 }
  0x87   : > { %494 = vmatprep.mubr.bf16.mxu0 %v2946_v5  ;;  %544 = vmatprep.mubr.bf16.mxu1 %v2946_v5 }
  0x8e   : > { %2801 = vmatmul.mubr.msk.bf16.gmra.mxu0 %vm397_vm2, %v2873_v10  ;;  %2806 = vmatmul.mubr.msk.bf16.gmra.mxu1 %vm397_vm2, %v2874_v19 }
  0x8f   : > { %504 = vmatprep.mubr.bf16.mxu0 %v2946_v5 }
  0x96   : > { %2802 = vmatmul.mubr.msk.bf16.gmra.mxu0 %vm397_vm2, %v2875_v22  ;;  %v311_v22 = vrot.slane %v3090_v4, 4 }
 0x136   : > { %v3129_v28 = vpop.f32.mrf.mxu0  ;;  %v516_v29 = vpop.f32.mrf.mxu1 }
 0x138   : > { %v3131_v30 = vpop.f32.mrf.mxu0  ;;  %v518_v31 = vpop.f32.mrf.mxu1 }
 0x139   : > { %v1163_v5 = vcombine.low %v516_v29, %v518_v31  ;;  %v1164_v34 = vcombine.high %v516_v29, %v518_v31  ;;  %v573_v23 = vcombine.low %v3129_v28, %v3131_v30  ;;  %v574_v26 = vcombine.high %v3129_v28, %v3131_v30 }
 0x13a   : > { %v470_v33 = vpop.f32.mrf.mxu0  ;;  %v520_v46 = vpop.f32.mrf.mxu1  ;;  %v3187_v28 = vadd.f32 %v311_v22, %v3090_v4 }
 0x13b   : > { %v1171_v35 = vrot.slane %v1163_v5, %v3133_v32  ;;  %v1178_v41 = vrot.slane %v1164_v34, %v3133_v32 }
 0x13c   : > { %v472_v36 = vpop.f32.mrf.mxu0  ;;  %v522_v12 = vpop.f32.mrf.mxu1 }
 0x13d   : > { %v623_v37 = vcombine.low %v470_v33, %v472_v36  ;;  %v624_v38 = vcombine.high %v470_v33, %v472_v36  ;;  %v1179_v39 = vcombine.high %v1171_v35, %v1171_v35  ;;  %v1180_v48 = vcombine.high %v1178_v41, %v1178_v41 }
 0x13e   : > { %v3136_v40 = vpop.f32.mrf.mxu0  ;;  %v3147_v50 = vrot.slane %v1171_v35, %v3133_v32  ;;  %v1194_v51 = vrot.slane %v1178_v41, %v3133_v32  ;;  %v1213_v58 = vcombine.low %v520_v46, %v522_v12  ;;  %v1214_v33 = vcombine.high %v520_v46, %v522_v12 }
 0x13f   : > { %v631_v42 = vrot.slane %v623_v37, %v3133_v32  ;;  %v638_v43 = vrot.slane %v624_v38, %v3133_v32  ;;  %v1201_v45 = vrot.slane %v1179_v39, %v3133_v32  ;;  %v1208_v54 = vrot.slane %v1180_v48, %v3133_v32  ;;  %v3190_v39 = vpop.f32.mrf.mxu1 }
 0x140   : > { %v478_v47 = vpop.f32.mrf.mxu0  ;;  %v1209_v55 = vcombine.high %v3147_v50, %v3147_v50  ;;  %v1210_v57 = vcombine.high %v1194_v51, %v1194_v51  ;;  %v1221_v3 = vrot.slane %v1213_v58, %v3133_v32  ;;  %v3184_v37 = vadd.f32 %v322_v8, %v3081_v63 }
 0x141   : > { %v639_v44 = vcombine.high %v631_v42, %v631_v42  ;;  %v640_v49 = vcombine.high %v638_v43, %v638_v43  ;;  %v3143_v18 = vrot.slane %v631_v42, %v3133_v32  ;;  %v654_v17 = vrot.slane %v638_v43, %v3133_v32 }
 0x142   : > { %v673_v52 = vcombine.low %v3136_v40, %v478_v47  ;;  %v1211_v21 = vcombine.high %v1201_v45, %v1201_v45  ;;  %v1212_v60 = vcombine.high %v1208_v54, %v1208_v54  ;;  %v1229_v10 = vcombine.high %v1221_v3, %v1221_v3  ;;  %v3180_v35 = vpop.f32.mrf.mxu0 }
 0x143   : > { %v661_v16 = vrot.slane %v639_v44, %v3133_v32  ;;  %v668_v14 = vrot.slane %v640_v49, %v3133_v32  ;;  %v669_v20 = vcombine.high %v3143_v18, %v3143_v18  ;;  %v670_v56 = vcombine.high %v654_v17, %v654_v17 }
 0x144   : > { %v681_v15 = vrot.slane %v673_v52, %v3133_v32  ;;  %v1647_v0 = vmul.f32 %v1194_v51, %v654_v17  ;;  %v3168_v19 = vrot.slane %v1221_v3, %v3133_v32  ;;  %v674_v29 = vcombine.high %v3136_v40, %v478_v47  ;;  %v3199_v46 = vpop.f32.mrf.mxu0  ;;  %v3202_v51 = vpop.f32.mrf.mxu1 }
 0x145   : > { %v671_v53 = vcombine.high %v661_v16, %v661_v16  ;;  %v672_v11 = vcombine.high %v668_v14, %v668_v14  ;;  %v1644_v62 = vmul.f32 %v1201_v45, %v661_v16  ;;  %v1645_v13 = vmul.f32 %v1209_v55, %v669_v20 }
 0x146   : > { %v689_v61 = vcombine.high %v681_v15, %v681_v15  ;;  %v1648_v1 = vmul.f32 %v1208_v54, %v668_v14  ;;  %v1649_v2 = vmul.f32 %v1210_v57, %v670_v56  ;;  %v3161_v7 = vrot.slane %v681_v15, %v3133_v32 }
 0x147   : > { %v1646_v59 = vmul.f32 %v1211_v21, %v671_v53  ;;  %v1867_v24 = vcombine.low %v1644_v62, %v1645_v13  ;;  %v1650_v25 = vmul.f32 %v1212_v60, %v672_v11  ;;  %v1251_v31 = vrot.slane %v1229_v10, %v3133_v32 }
 0x148   : > { %v3165_v9 = vrot.slane %v689_v61, %v3133_v32  ;;  %v1869_v27 = vcombine.low %v1648_v1, %v1649_v2  ;;  %v1651_v34 = vmul.f32 %v3168_v19, %v3161_v7  ;;  %v581_v40 = vrot.slane %v573_v23, %v3133_v32 }
 0x149   : > { %v1868_v6 = vcombine.low %v1646_v59, %v1647_v0  ;;  %v1877_v30 = vrot.slane %v1867_v24, %v3133_v32  ;;  %v588_v41 = vrot.slane %v574_v26, %v3133_v32  ;;  %v688_v43 = vrot.slane %v674_v29, %v3133_v32 }
 0x14a   : > { %v1652_v36 = vmul.f32 %v1251_v31, %v3165_v9  ;;  %v1870_v38 = vcombine.low %v1650_v25, %v1651_v34  ;;  %v1891_v42 = vrot.slane %v1869_v27, %v3133_v32  ;;  %v1228_v63 = vrot.slane %v1214_v33, %v3133_v32 }
 0x14b   : > { %v1884_v5 = vrot.slane %v1868_v6, %v3133_v32  ;;  %v589_v53 = vcombine.high %v581_v40, %v581_v40  ;;  %v723_v21 = vcombine.low %v3180_v35, %v3199_v46  ;;  %v590_v12 = vcombine.high %v588_v41, %v588_v41 }
 0x14c   : > { %v1898_v45 = vrot.slane %v1870_v38, %v3133_v32  ;;  %v1939_v4 = vrot.slane %v1652_v36, %v3133_v32  ;;  %v690_v15 = vcombine.high %v688_v43, %v688_v43  ;;  %v1230_v14 = vcombine.high %v1228_v63, %v1228_v63 }
 0x14d   : > { %v1899_v44 = vcombine.low %v1877_v30, %v1884_v5  ;;  %v1900_v47 = vcombine.high %v1877_v30, %v1884_v5  ;;  %v1263_v57 = vcombine.low %v3190_v39, %v3202_v51  ;;  %v3214_v58 = vrot.slane %v581_v40, %v3133_v32 }
 0x14e   : > { %v1901_v49 = vcombine.low %v1891_v42, %v1898_v45  ;;  %v1902_v16 = vcombine.high %v1891_v42, %v1898_v45  ;;  %v1940_v17 = vcombine.high %v1939_v4, %v1939_v4  ;;  %v3217_v59 = vrot.slane %v588_v41, %v3133_v32 }
 0x14f   : > { %v1909_v54 = vrot.slane %v1899_v44, %v3133_v32  ;;  %v1916_v20 = vrot.slane %v1900_v47, %v3133_v32  ;;  %v1643_v60 = vmul.f32 %v3147_v50, %v3143_v18  ;;  %v704_v11 = vrot.slane %v688_v43, %v3133_v32 }
 0x150   : > { %v1923_v55 = vrot.slane %v1901_v49, %v3133_v32  ;;  %v1930_v56 = vrot.slane %v1902_v16, %v3133_v32  ;;  %v1954_v61 = vrot.slane %v1940_v17, %v3133_v32  ;;  %v721_v62 = vcombine.high %v3165_v9, %v3165_v9  ;;  %v530_v16 = vpop.f32.mrf.mxu1 }
 0x151   : > { %v1261_v13 = vcombine.high %v1251_v31, %v1251_v31  ;;  %v731_v0 = vrot.slane %v723_v21, %v3133_v32  ;;  %v718_v1 = vrot.slane %v690_v15, %v3133_v32  ;;  %v719_v2 = vcombine.high %v3161_v7, %v3161_v7 }
 0x152   : > { %v1258_v3 = vrot.slane %v1230_v14, %v3133_v32  ;;  %v1947_v6 = vrot.slane %v1939_v4, %v3133_v32  ;;  %v1259_v18 = vcombine.high %v3168_v19, %v3168_v19  ;;  %v1931_v50 = vcombine.low %v1909_v54, %v1923_v55  ;;  %v486_v4 = vpop.f32.mrf.mxu0 }
 0x153   : > { %v1932_v8 = vcombine.low %v1916_v20, %v1930_v56  ;;  %v1271_v10 = vrot.slane %v1263_v57, %v3133_v32  ;;  %v3235_v9 = vrot.slane %v589_v53, %v3133_v32  ;;  %v3238_v22 = vrot.slane %v590_v12, %v3133_v32 }
 0x154   : > { %v1244_v23 = vrot.slane %v1228_v63, %v3133_v32  ;;  %v2540_v7 = vsel %vm2515_vm3, %v1954_v61, 0.0  ;;  %v619_v24 = vcombine.high %v3214_v58, %v3214_v58  ;;  %v1654_v25 = vmul.f32 %v1261_v13, %v721_v62  ;;  %v488_v57 = vpop.f32.mrf.mxu0  ;;  %v532_v13 = vpop.f32.mrf.mxu1 }
 0x155   : > { %v739_v26 = vcombine.high %v731_v0, %v731_v0  ;;  %v1279_v19 = vcombine.high %v1271_v10, %v1271_v10  ;;  %v3245_v27 = vrot.slane %v1643_v60, %v3133_v32  ;;  %v1656_v29 = vmul.f32 %v1258_v3, %v718_v1 }
 0x156   : > { %v2532_v31 = vsel %vm2515_vm3, %v1947_v6, 0.0  ;;  %v724_v5 = vcombine.high %v3180_v35, %v3199_v46  ;;  %v720_v33 = vcombine.high %v704_v11, %v704_v11  ;;  %v1653_v34 = vmul.f32 %v1259_v18, %v719_v2 }
 0x157   : > { %v2533_v36 = vadd.f32 %v2532_v31, %v1931_v50  ;;  %v2541_v30 = vadd.f32 %v2540_v7, %v1932_v8  ;;  %v722_v38 = vcombine.high %v718_v1, %v718_v1  ;;  %v1260_v40 = vcombine.high %v1244_v23, %v1244_v23 }
 0x158   : > { %v1655_v41 = vmul.f32 %v1244_v23, %v704_v11  ;;  %v1264_v42 = vcombine.high %v3190_v39, %v3202_v51  ;;  %v1262_v43 = vcombine.high %v1258_v3, %v1258_v3  ;;  %v1955_v44 = vcombine.low %v1653_v34, %v1654_v25 }
 0x159   : > { %v761_v63 = vrot.slane %v739_v26, %v3133_v32  ;;  %v1301_v45 = vrot.slane %v1279_v19, %v3133_v32  ;;  %v620_v35 = vcombine.high %v3217_v59, %v3217_v59  ;;  %v738_v47 = vrot.slane %v724_v5, %v3133_v32 }
 0x15a   : > { %v1956_v46 = vcombine.low %v1655_v41, %v1656_v29  ;;  %v747_v49 = vrot.slane %v731_v0, %v3133_v32  ;;  %v621_v17 = vcombine.high %v3235_v9, %v3235_v9  ;;  %v2534_v39 = vrot.slane %v2533_v36, 4 }
 0x15b   : > { %v2542_v51 = vrot.slane %v2541_v30, 4  ;;  %v1287_v53 = vrot.slane %v1271_v10, %v3133_v32  ;;  %v1852_v12 = vcombine.high %v3245_v27, %v3245_v27  ;;  %v1859_v54 = vrot.slane %v3245_v27, %v3133_v32 }
 0x15c   : > { %v1278_v15 = vrot.slane %v1264_v42, %v3133_v32  ;;  %v1657_v14 = vmul.f32 %v1260_v40, %v720_v33  ;;  %v1658_v20 = vmul.f32 %v1262_v43, %v722_v38  ;;  %v1965_v55 = vrot.slane %v1955_v44, %v3133_v32 }
 0x15d   : > { %v1660_v56 = vmul.f32 %v1301_v45, %v761_v63  ;;  %v1972_v60 = vrot.slane %v1956_v46, %v3133_v32  ;;  %v740_v61 = vcombine.high %v738_v47, %v738_v47  ;;  %v754_v11 = vrot.slane %v738_v47, %v3133_v32 }
 0x15e   : > { %v769_v62 = vcombine.high %v747_v49, %v747_v49  ;;  %v2535_v0 = vadd.f32 %v2534_v39, %v2533_v36  ;;  %v2543_v1 = vadd.f32 %v2542_v51, %v2541_v30  ;;  %v1309_v2 = vcombine.high %v1287_v53, %v1287_v53 }
 0x15f   : > { %v1659_v3 = vmul.f32 %v1287_v53, %v747_v49  ;;  %v1866_v6 = vrot.slane %v1852_v12, %v3133_v32  ;;  %v1280_v18 = vcombine.high %v1278_v15, %v1278_v15  ;;  %v1294_v50 = vrot.slane %v1278_v15, %v3133_v32 }
 0x160   : > { %v773_v8 = vcombine.low %v486_v4, %v488_v57  ;;  %v1957_v10 = vcombine.low %v1657_v14, %v1658_v20  ;;  %v1987_v23 = vcombine.low %v1965_v55, %v1972_v60  ;;  %v1313_v25 = vcombine.low %v530_v16, %v532_v13 }
 0x161   : > { %v1958_v7 = vcombine.low %v1659_v3, %v1660_v56  ;;  %v3274_v26 = vrot.slane %v740_v61, %v3133_v32  ;;  %v770_v19 = vcombine.high %v754_v11, %v754_v11  ;;  %v771_v27 = vcombine.high %v761_v63, %v761_v63  ;;  %v3288_v63 = vpop.f32.mrf.mxu0 }
 0x162   : > { %v774_v29 = vcombine.high %v486_v4, %v488_v57  ;;  %v2536_v31 = vrot.slane %v2535_v0, 2  ;;  %v2544_v5 = vrot.slane %v2543_v1, 2  ;;  %v1311_v33 = vcombine.high %v1301_v45, %v1301_v45 }
 0x163   : > { %v1661_v34 = vmul.f32 %v1309_v2, %v769_v62  ;;  %v3277_v36 = vrot.slane %v1280_v18, %v3133_v32  ;;  %v1310_v30 = vcombine.high %v1294_v50, %v1294_v50  ;;  %v781_v38 = vrot.slane %v773_v8, %v3133_v32  ;;  %v3299_v57 = vpop.f32.mrf.mxu0 }
 0x164   : > { %v1314_v40 = vcombine.high %v530_v16, %v532_v13  ;;  %v3281_v41 = vsel %vm2515_vm3, %v1859_v54, 0.0  ;;  %v3284_v42 = vsel %vm2515_vm3, %v1866_v6, 0.0  ;;  %v1986_v43 = vrot.slane %v1958_v7, %v3133_v32 }
 0x165   : > { %v1321_v44 = vrot.slane %v1313_v25, %v3133_v32  ;;  %v1979_v45 = vrot.slane %v1957_v10, %v3133_v32  ;;  %v1988_v4 = vcombine.high %v1965_v55, %v1972_v60  ;;  %v3292_v46 = vrot.slane %v1987_v23, %v3133_v32 }
 0x166   : > { %v788_v47 = vrot.slane %v774_v29, %v3133_v32  ;;  %v2537_v49 = vadd.f32 %v2536_v31, %v2535_v0  ;;  %v2545_v16 = vadd.f32 %v2544_v5, %v2543_v1  ;;  %v1662_v39 = vmul.f32 %v1311_v33, %v771_v27 }
 0x167   : > { %v2027_v51 = vrot.slane %v1661_v34, %v3133_v32  ;;  %v1664_v53 = vmul.f32 %v3277_v36, %v3274_v26  ;;  %v1665_v12 = vmul.f32 %v1310_v30, %v770_v19  ;;  %v789_v54 = vcombine.high %v781_v38, %v781_v38  ;;  %v536_v34 = vpop.f32.mrf.mxu1 }
 0x168   : > { %v1328_v15 = vrot.slane %v1314_v40, %v3133_v32  ;;  %v1663_v14 = vmul.f32 %v1294_v50, %v754_v11  ;;  %v1989_v20 = vcombine.low %v1979_v45, %v1986_v43  ;;  %v1990_v55 = vcombine.high %v1979_v45, %v1986_v43 }
 0x169   : > { %v1329_v56 = vcombine.high %v1321_v44, %v1321_v44  ;;  %v2004_v60 = vrot.slane %v1988_v4, %v3133_v32  ;;  %v772_v61 = vcombine.high %v3274_v26, %v3274_v26  ;;  %v797_v62 = vrot.slane %v781_v38, %v3133_v32 }
 0x16a   : > { %v1337_v13 = vrot.slane %v1321_v44, %v3133_v32  ;;  %v2538_v0 = vrot.slane %v2537_v49, 1  ;;  %v2546_v1 = vrot.slane %v2545_v16, 1  ;;  %v2028_v2 = vcombine.high %v2027_v51, %v2027_v51 }
 0x16b   : > { %v2043_v3 = vcombine.low %v1662_v39, %v1663_v14  ;;  %v2044_v6 = vcombine.low %v1664_v53, %v1665_v12  ;;  %v790_v11 = vcombine.high %v788_v47, %v788_v47  ;;  %v1330_v18 = vcombine.high %v1328_v15, %v1328_v15 }
 0x16c   : > { %v823_v50 = vcombine.low %v3288_v63, %v3299_v57  ;;  %v2011_v8 = vrot.slane %v1989_v20, %v3133_v32  ;;  %v2018_v10 = vrot.slane %v1990_v55, %v3133_v32  ;;  %v811_v23 = vrot.slane %v789_v54, %v3133_v32  ;;  %v538_v20 = vpop.f32.mrf.mxu1 }
 0x16d   : > { %v1351_v7 = vrot.slane %v1329_v56, %v3133_v32  ;;  %v1312_v25 = vcombine.high %v3277_v36, %v3277_v36  ;;  %v2035_v26 = vrot.slane %v2027_v51, %v3133_v32  ;;  %v819_v19 = vcombine.high %v797_v62, %v797_v62 }
 0x16e   : > { %v1359_v27 = vcombine.high %v1337_v13, %v1337_v13  ;;  %v3315_v29 = vadd.f32 %v2538_v0, %v2537_v49  ;;  %v3317_v31 = vadd.f32 %v2546_v1, %v2545_v16  ;;  %v2042_v5 = vrot.slane %v2028_v2, %v3133_v32 }
 0x16f   : > { %v3321_v33 = vrot.slane %v2043_v3, %v3133_v32  ;;  %v3324_v30 = vrot.slane %v2044_v6, %v3133_v32  ;;  %v818_v38 = vrot.slane %v790_v11, %v3133_v32  ;;  %v1358_v36 = vrot.slane %v1330_v18, %v3133_v32 }
 0x170   : > { %v831_v40 = vrot.slane %v823_v50, %v3133_v32  ;;  %v2019_v43 = vcombine.low %v3292_v46, %v2011_v8  ;;  %v2020_v44 = vcombine.low %v2004_v60, %v2018_v10  ;;  %v821_v45 = vcombine.high %v811_v23, %v811_v23  ;;  %v3343_v50 = vpop.f32.mrf.mxu0 }
 0x171   : > { %v1361_v4 = vcombine.high %v1351_v7, %v1351_v7  ;;  %v804_v49 = vrot.slane %v788_v47, %v3133_v32  ;;  %v1344_v16 = vrot.slane %v1328_v15, %v3133_v32  ;;  %v1668_v39 = vmul.f32 %v1351_v7, %v811_v23 }
 0x172   : > { %v1669_v51 = vmul.f32 %v1359_v27, %v819_v19  ;;  %v2075_v53 = vcombine.low %v3321_v33, %v3324_v30  ;;  %v2548_v12 = vsel %vm2515_vm3, %v2035_v26, 0.0  ;;  %v1666_v54 = vmul.f32 %v1312_v25, %v772_v61 }
 0x173   : > { %v1667_v14 = vmul.f32 %v1337_v13, %v797_v62  ;;  %v2556_v55 = vsel %vm2515_vm3, %v2042_v5, 0.0  ;;  %v822_v46 = vcombine.high %v818_v38, %v818_v38  ;;  %v1362_v56 = vcombine.high %v1358_v36, %v1358_v36 }
 0x174   : > { %v839_v60 = vcombine.high %v831_v40, %v831_v40  ;;  %v2076_v47 = vcombine.high %v3321_v33, %v3324_v30  ;;  %v2549_v0 = vadd.f32 %v2548_v12, %v2019_v43  ;;  %v2557_v15 = vadd.f32 %v2556_v55, %v2020_v44 }
 0x175   : > { %v1670_v1 = vmul.f32 %v1361_v4, %v821_v45  ;;  %v820_v2 = vcombine.high %v804_v49, %v804_v49  ;;  %v1360_v3 = vcombine.high %v1344_v16, %v1344_v16  ;;  %v2046_v6 = vcombine.low %v1668_v39, %v1669_v51  ;;  %v498_v45 = vpop.f32.mrf.mxu0 }
 0x176   : > { %v1363_v11 = vcombine.low %v536_v34, %v538_v20  ;;  %v3339_v18 = vrot.slane %v2075_v53, %v3133_v32  ;;  %v2045_v61 = vcombine.low %v1666_v54, %v1667_v14  ;;  %v824_v62 = vcombine.high %v3288_v63, %v3299_v57  ;;  %v3350_v57 = vpop.f32.mrf.mxu1 }
 0x177   : > { %v1364_v13 = vcombine.high %v536_v34, %v538_v20  ;;  %v1674_v8 = vmul.f32 %v1362_v56, %v822_v46  ;;  %v847_v10 = vrot.slane %v831_v40, %v3133_v32  ;;  %v861_v23 = vrot.slane %v839_v60, %v3133_v32 }
 0x178   : > { %v1371_v7 = vrot.slane %v1363_v11, %v3133_v32  ;;  %v2550_v25 = vrot.slane %v2549_v0, 4  ;;  %v2558_v26 = vrot.slane %v2557_v15, 4  ;;  %v1672_v19 = vmul.f32 %v1358_v36, %v818_v38  ;;  %v542_v55 = vpop.f32.mrf.mxu1 }
 0x179   : > { %v2115_v27 = vrot.slane %v1670_v1, %v3133_v32  ;;  %v1671_v5 = vmul.f32 %v1344_v16, %v804_v49  ;;  %v1673_v33 = vmul.f32 %v1360_v3, %v820_v2  ;;  %v2074_v30 = vrot.slane %v2046_v6, %v3133_v32 }
 0x17a   : > { %v1379_v63 = vcombine.high %v1371_v7, %v1371_v7  ;;  %v2067_v34 = vrot.slane %v2045_v61, %v3133_v32  ;;  %v838_v40 = vrot.slane %v824_v62, %v3133_v32  ;;  %v1378_v43 = vrot.slane %v1364_v13, %v3133_v32 }
 0x17b   : > { %v1387_v44 = vrot.slane %v1371_v7, %v3133_v32  ;;  %v2132_v4 = vcombine.low %v1673_v33, %v1674_v8  ;;  %v869_v38 = vcombine.high %v847_v10, %v847_v10  ;;  %v871_v36 = vcombine.high %v861_v23, %v861_v23 }
 0x17c   : > { %v1401_v49 = vrot.slane %v1379_v63, %v3133_v32  ;;  %v3357_v16 = vadd.f32 %v2550_v25, %v2549_v0  ;;  %v2116_v39 = vcombine.high %v2115_v27, %v2115_v27  ;;  %v2131_v51 = vcombine.low %v1671_v5, %v1672_v19 }
 0x17d   : > { %v1409_v53 = vcombine.high %v1387_v44, %v1387_v44  ;;  %v2077_v12 = vcombine.low %v2067_v34, %v2074_v30  ;;  %v2078_v54 = vcombine.high %v2067_v34, %v2074_v30  ;;  %v873_v20 = vcombine.low %v3343_v50, %v498_v45 }
 0x17e   : > { %v1411_v14 = vcombine.high %v1401_v49, %v1401_v49  ;;  %v3361_v46 = vrot.slane %v838_v40, %v3133_v32  ;;  %v3364_v56 = vrot.slane %v1378_v43, %v3133_v32  ;;  %v1675_v60 = vmul.f32 %v1387_v44, %v847_v10 }
 0x17f   : > { %v1676_v1 = vmul.f32 %v1401_v49, %v861_v23  ;;  %v2092_v0 = vrot.slane %v2076_v47, %v3133_v32  ;;  %v2148_v2 = vrot.slane %v2132_v4, %v3133_v32  ;;  %v1677_v3 = vmul.f32 %v1409_v53, %v869_v38 }
 0x180   : > { %v1678_v6 = vmul.f32 %v1411_v14, %v871_v36  ;;  %v2552_v11 = vrot.slane %v3357_v16, 2  ;;  %v3369_v61 = vadd.f32 %v2558_v26, %v2557_v15  ;;  %v1413_v13 = vcombine.low %v3350_v57, %v542_v55 }
 0x181   : > { %v2133_v62 = vcombine.low %v1675_v60, %v1676_v1  ;;  %v2123_v8 = vrot.slane %v2115_v27, %v3133_v32  ;;  %v2141_v7 = vrot.slane %v2131_v51, %v3133_v32  ;;  %v881_v10 = vrot.slane %v873_v20, %v3133_v32 }
 0x182   : > { %v2134_v25 = vcombine.low %v1677_v3, %v1678_v6  ;;  %v2099_v47 = vrot.slane %v2077_v12, %v3133_v32  ;;  %v2106_v23 = vrot.slane %v2078_v54, %v3133_v32  ;;  %v2130_v19 = vrot.slane %v2116_v39, %v3133_v32 }
 0x183   : > { %v1679_v15 = vmul.f32 %v3364_v56, %v3361_v46  ;;  %v2163_v26 = vcombine.low %v2141_v7, %v2148_v2  ;;  %v840_v5 = vcombine.high %v838_v40, %v838_v40  ;;  %v874_v27 = vcombine.high %v3343_v50, %v498_v45 }
 0x184   : > { %v2162_v33 = vrot.slane %v2134_v25, %v3133_v32  ;;  %v1380_v30 = vcombine.high %v1378_v43, %v1378_v43  ;;  %v2155_v63 = vrot.slane %v2133_v62, %v3133_v32  ;;  %v1414_v34 = vcombine.high %v3350_v57, %v542_v55  ;;  %v3403_v62 = vpop.f32.mrf.mxu0 }
 0x185   : > { %v1421_v44 = vrot.slane %v1413_v13, %v3133_v32  ;;  %v2560_v4 = vrot.slane %v3369_v61, 2  ;;  %v2164_v38 = vcombine.high %v2141_v7, %v2148_v2  ;;  %v2564_v36 = vsel %vm2515_vm3, %v2123_v8, 0.0 }
 0x186   : > { %v889_v49 = vcombine.high %v881_v10, %v881_v10  ;;  %v2107_v39 = vcombine.low %v3339_v18, %v2099_v47  ;;  %v2165_v40 = vcombine.low %v2155_v63, %v2162_v33  ;;  %v2203_v51 = vrot.slane %v1679_v15, %v3133_v32 }
 0x187   : > { %v1429_v53 = vcombine.high %v1421_v44, %v1421_v44  ;;  %v2108_v50 = vcombine.low %v2092_v0, %v2106_v23  ;;  %v2173_v43 = vrot.slane %v2163_v26, %v3133_v32  ;;  %v2572_v45 = vsel %vm2515_vm3, %v2130_v19, 0.0 }
 0x188   : > { %v888_v57 = vrot.slane %v874_v27, %v3133_v32  ;;  %v868_v12 = vrot.slane %v840_v5, %v3133_v32  ;;  %v1408_v54 = vrot.slane %v1380_v30, %v3133_v32  ;;  %v2166_v14 = vcombine.high %v2155_v63, %v2162_v33 }
 0x189   : > { %v1428_v20 = vrot.slane %v1414_v34, %v3133_v32  ;;  %v2180_v18 = vrot.slane %v2164_v38, %v3133_v32  ;;  %v870_v55 = vcombine.high %v3361_v46, %v3361_v46  ;;  %v911_v60 = vrot.slane %v889_v49, %v3133_v32  ;;  %v502_v34 = vpop.f32.mrf.mxu0 }
 0x18a   : > { %v1451_v1 = vrot.slane %v1429_v53, %v3133_v32  ;;  %v2565_v0 = vadd.f32 %v2564_v36, %v2107_v39  ;;  %v1410_v2 = vcombine.high %v3364_v56, %v3364_v56  ;;  %v2187_v3 = vrot.slane %v2165_v40, %v3133_v32 }
 0x18b   : > { %v2204_v6 = vcombine.high %v2203_v51, %v2203_v51  ;;  %v2573_v13 = vadd.f32 %v2572_v45, %v2108_v50  ;;  %v890_v8 = vcombine.high %v888_v57, %v888_v57  ;;  %v897_v7 = vrot.slane %v881_v10, %v3133_v32 }
 0x18c   : > { %v1437_v25 = vrot.slane %v1421_v44, %v3133_v32  ;;  %v872_v46 = vcombine.high %v868_v12, %v868_v12  ;;  %v1412_v47 = vcombine.high %v1408_v54, %v1408_v54  ;;  %v2194_v23 = vrot.slane %v2166_v14, %v3133_v32 }
 0x18d   : > { %v1430_v19 = vcombine.high %v1428_v20, %v1428_v20  ;;  %v1680_v15 = vmul.f32 %v1408_v54, %v868_v12  ;;  %v2211_v26 = vrot.slane %v2203_v51, %v3133_v32  ;;  %v921_v56 = vcombine.high %v911_v60, %v911_v60 }
 0x18e   : > { %v1461_v5 = vcombine.high %v1451_v1, %v1451_v1  ;;  %v1681_v33 = vmul.f32 %v1410_v2, %v870_v55  ;;  %v2195_v27 = vcombine.low %v2173_v43, %v2187_v3  ;;  %v2218_v30 = vrot.slane %v2204_v6, %v3133_v32 }
 0x18f   : > { %v904_v63 = vrot.slane %v888_v57, %v3133_v32  ;;  %v918_v10 = vrot.slane %v890_v8, %v3133_v32  ;;  %v919_v44 = vcombine.high %v897_v7, %v897_v7  ;;  %v1444_v38 = vrot.slane %v1428_v20, %v3133_v32  ;;  %v546_v20 = vpop.f32.mrf.mxu1 }
 0x190   : > { %v1459_v36 = vcombine.high %v1437_v25, %v1437_v25  ;;  %v2196_v49 = vcombine.low %v2180_v18, %v2194_v23  ;;  %v1458_v39 = vrot.slane %v1430_v19, %v3133_v32  ;;  %v1682_v40 = vmul.f32 %v1412_v47, %v872_v46 }
 0x191   : > { %v1683_v51 = vmul.f32 %v1437_v25, %v897_v7  ;;  %v3417_v53 = vadd.f32 %v2552_v11, %v3357_v16  ;;  %v2580_v50 = vsel %vm2515_vm3, %v2211_v26, 0.0  ;;  %v1686_v43 = vmul.f32 %v1461_v5, %v921_v56  ;;  %v506_v7 = vpop.f32.mrf.mxu0  ;;  %v548_v56 = vpop.f32.mrf.mxu1 }
 0x192   : > { %v923_v45 = vcombine.low %v3403_v62, %v502_v34  ;;  %v3422_v57 = vadd.f32 %v2560_v4, %v3369_v61  ;;  %v2566_v12 = vrot.slane %v2565_v0, 4  ;;  %v2574_v54 = vrot.slane %v2573_v13, 4 }
 0x193   : > { %v2581_v14 = vadd.f32 %v2580_v50, %v2195_v27  ;;  %v2588_v18 = vsel %vm2515_vm3, %v2218_v30, 0.0  ;;  %v1684_v55 = vmul.f32 %v1451_v1, %v911_v60  ;;  %v1685_v2 = vmul.f32 %v1459_v36, %v919_v44 }
 0x194   : > { %v1687_v3 = vmul.f32 %v1444_v38, %v904_v63  ;;  %v2219_v6 = vcombine.low %v1680_v15, %v1681_v33  ;;  %v2589_v16 = vadd.f32 %v2588_v18, %v2196_v49  ;;  %v1688_v11 = vmul.f32 %v1458_v39, %v918_v10 }
 0x195   : > { %v2220_v8 = vcombine.low %v1682_v40, %v1683_v51  ;;  %v920_v25 = vcombine.high %v904_v63, %v904_v63  ;;  %v922_v46 = vcombine.high %v918_v10, %v918_v10  ;;  %v931_v61 = vrot.slane %v923_v45, %v3133_v32  ;;  %v508_v10 = vpop.f32.mrf.mxu0 }
 0x196   : > { %v2222_v47 = vcombine.low %v1686_v43, %v1687_v3  ;;  %v2582_v4 = vrot.slane %v2581_v14, 4  ;;  %v1460_v23 = vcombine.high %v1444_v38, %v1444_v38  ;;  %v1462_v19 = vcombine.high %v1458_v39, %v1458_v39 }
 0x197   : > { %v924_v26 = vcombine.high %v3403_v62, %v502_v34  ;;  %v3428_v1 = vadd.f32 %v2566_v12, %v2565_v0  ;;  %v3430_v15 = vadd.f32 %v2574_v54, %v2573_v13  ;;  %v2221_v5 = vcombine.low %v1684_v55, %v1685_v2  ;;  %v550_v55 = vpop.f32.mrf.mxu1 }
 0x198   : > { %v2229_v33 = vrot.slane %v2219_v6, %v3133_v32  ;;  %v2590_v27 = vrot.slane %v2589_v16, 4  ;;  %v2236_v30 = vrot.slane %v2220_v8, %v3133_v32  ;;  %v3435_v63 = vrot.slane %v1688_v11, %v3133_v32 }
 0x199   : > { %v2250_v44 = vrot.slane %v2222_v47, %v3133_v32  ;;  %v939_v62 = vcombine.high %v931_v61, %v931_v61  ;;  %v1463_v34 = vcombine.low %v546_v20, %v548_v56  ;;  %v1464_v38 = vcombine.high %v546_v20, %v548_v56 }
 0x19a   : > { %v3438_v36 = vadd.f32 %v2582_v4, %v2581_v14  ;;  %v1689_v0 = vmul.f32 %v1460_v23, %v920_v25  ;;  %v1690_v13 = vmul.f32 %v1462_v19, %v922_v46  ;;  %v938_v49 = vrot.slane %v924_v26, %v3133_v32 }
 0x19b   : > { %v2243_v39 = vrot.slane %v2221_v5, %v3133_v32  ;;  %v1471_v40 = vrot.slane %v1463_v34, %v3133_v32  ;;  %v1478_v51 = vrot.slane %v1464_v38, %v3133_v32  ;;  %v973_v50 = vcombine.low %v506_v7, %v508_v10 }
 0x19c   : > { %v3444_v43 = vadd.f32 %v2590_v27, %v2589_v16  ;;  %v2251_v45 = vcombine.low %v2229_v33, %v2236_v30  ;;  %v2292_v12 = vcombine.high %v3435_v63, %v3435_v63  ;;  %v2299_v54 = vrot.slane %v3435_v63, %v3133_v32  ;;  %v552_v27 = vpop.f32.mrf.mxu1 }
 0x19d   : > { %v2253_v14 = vcombine.low %v2243_v39, %v2250_v44  ;;  %v961_v20 = vrot.slane %v939_v62, %v3133_v32  ;;  %v1479_v18 = vcombine.high %v1471_v40, %v1471_v40  ;;  %v974_v2 = vcombine.high %v506_v7, %v508_v10 }
 0x19e   : > { %v940_v3 = vcombine.high %v938_v49, %v938_v49  ;;  %v947_v6 = vrot.slane %v931_v61, %v3133_v32  ;;  %v1480_v11 = vcombine.high %v1478_v51, %v1478_v51  ;;  %v1487_v16 = vrot.slane %v1471_v40, %v3133_v32 }
 0x19f   : > { %v954_v8 = vrot.slane %v938_v49, %v3133_v32  ;;  %v1494_v25 = vrot.slane %v1478_v51, %v3133_v32  ;;  %v1501_v46 = vrot.slane %v1479_v18, %v3133_v32  ;;  %v981_v47 = vrot.slane %v973_v50, %v3133_v32 }
 0x1a0   : > { %v2252_v4 = vcombine.high %v2229_v33, %v2236_v30  ;;  %v2254_v23 = vcombine.high %v2243_v39, %v2250_v44  ;;  %v3458_v19 = vrot.slane %v2292_v12, %v3133_v32  ;;  %v2307_v7 = vcombine.low %v1689_v0, %v1690_v13 }
 0x1a1   : > { %v3461_v26 = vrot.slane %v2253_v14, %v3133_v32  ;;  %v971_v61 = vcombine.high %v961_v20, %v961_v20  ;;  %v1511_v56 = vcombine.high %v1501_v46, %v1501_v46  ;;  %v988_v5 = vrot.slane %v974_v2, %v3133_v32 }
 0x1a2   : > { %v968_v10 = vrot.slane %v940_v3, %v3133_v32  ;;  %v969_v62 = vcombine.high %v947_v6, %v947_v6  ;;  %v1508_v34 = vrot.slane %v1480_v11, %v3133_v32  ;;  %v1509_v38 = vcombine.high %v1487_v16, %v1487_v16 }
 0x1a3   : > { %v3467_v33 = vrot.slane %v2251_v45, %v3133_v32  ;;  %v970_v30 = vcombine.high %v954_v8, %v954_v8  ;;  %v1510_v44 = vcombine.high %v1494_v25, %v1494_v25  ;;  %v989_v0 = vcombine.high %v981_v47, %v981_v47 }
 0x1a4   : > { %v3470_v13 = vrot.slane %v2252_v4, %v3133_v32  ;;  %v3473_v49 = vrot.slane %v2254_v23, %v3133_v32  ;;  %v3476_v39 = vrot.slane %v2307_v7, %v3133_v32  ;;  %v1513_v40 = vcombine.low %v550_v55, %v552_v27 }
 0x1a5   : > { %v2283_v51 = vcombine.low %v3467_v33, %v3461_v26  ;;  %v1692_v50 = vmul.f32 %v1501_v46, %v961_v20  ;;  %v1694_v12 = vmul.f32 %v1511_v56, %v971_v61  ;;  %v990_v45 = vcombine.high %v988_v5, %v988_v5 }
 0x1a6   : > { %v1691_v14 = vmul.f32 %v1487_v16, %v947_v6  ;;  %v1693_v18 = vmul.f32 %v1509_v38, %v969_v62  ;;  %v1696_v2 = vmul.f32 %v1508_v34, %v968_v10  ;;  %v1514_v3 = vcombine.high %v550_v55, %v552_v27 }
 0x1a7   : > { %v1697_v11 = vmul.f32 %v1510_v44, %v970_v30  ;;  %v997_v4 = vrot.slane %v981_v47, %v3133_v32  ;;  %v1004_v23 = vrot.slane %v988_v5, %v3133_v32  ;;  %v1011_v48 = vrot.slane %v989_v0, %v3133_v32  ;;  %v510_v5 = vpop.f32.mrf.mxu0 }
 0x1a8   : > { %v2284_v7 = vcombine.low %v3470_v13, %v3473_v49  ;;  %v972_v52 = vcombine.high %v968_v10, %v968_v10  ;;  %v1695_v60 = vmul.f32 %v1494_v25, %v954_v8  ;;  %v1521_v20 = vrot.slane %v1513_v40, %v3133_v32 }
 0x1a9   : > { %v1512_v46 = vcombine.high %v1508_v34, %v1508_v34  ;;  %v2308_v26 = vcombine.low %v1691_v14, %v1692_v50  ;;  %v2309_v6 = vcombine.low %v1693_v18, %v1694_v12  ;;  %v1018_v16 = vrot.slane %v990_v45, %v3133_v32  ;;  %v512_v12 = vpop.f32.mrf.mxu0 }
 0x1aa   : > { %v2310_v55 = vcombine.low %v1695_v60, %v1696_v2  ;;  %v1528_v61 = vrot.slane %v1514_v3, %v3133_v32  ;;  %v1529_v47 = vcombine.high %v1521_v20, %v1521_v20  ;;  %v1537_v56 = vrot.slane %v1521_v20, %v3133_v32 }
 0x1ab   : > { %v3490_v27 = vrot.slane %v1697_v11, %v3133_v32  ;;  %v1019_v62 = vcombine.high %v997_v4, %v997_v4  ;;  %v1020_v10 = vcombine.high %v1004_v23, %v1004_v23  ;;  %v1021_v8 = vcombine.high %v1011_v48, %v1011_v48 }
 0x1ac   : > { %v1530_v25 = vcombine.high %v1528_v61, %v1528_v61  ;;  %v1544_v34 = vrot.slane %v1528_v61, %v3133_v32  ;;  %v1551_v38 = vrot.slane %v1529_v47, %v3133_v32  ;;  %v1559_v33 = vcombine.high %v1537_v56, %v1537_v56 }
 0x1ad   : > { %v2331_v60 = vrot.slane %v2309_v6, %v3133_v32  ;;  %v1022_v30 = vcombine.high %v1018_v16, %v1018_v16  ;;  %v1698_v44 = vmul.f32 %v1512_v46, %v972_v52  ;;  %v1699_v0 = vmul.f32 %v1537_v56, %v997_v4 }
 0x1ae   : > { %v1558_v13 = vrot.slane %v1530_v25, %v3133_v32  ;;  %v1560_v49 = vcombine.high %v1544_v34, %v1544_v34  ;;  %v1561_v40 = vcombine.high %v1551_v38, %v1551_v38  ;;  %v1700_v50 = vmul.f32 %v1551_v38, %v1011_v48 }
 0x1af   : > { %v2324_v45 = vrot.slane %v2308_v26, %v3133_v32  ;;  %v2338_v14 = vrot.slane %v2310_v55, %v3133_v32  ;;  %v1701_v18 = vmul.f32 %v1559_v33, %v1019_v62  ;;  %v1703_v2 = vmul.f32 %v1544_v34, %v1004_v23 }
 0x1b0   : > { %v1562_v3 = vcombine.high %v1558_v13, %v1558_v13  ;;  %v1702_v11 = vmul.f32 %v1561_v40, %v1021_v8  ;;  %v1704_v20 = vmul.f32 %v1558_v13, %v1018_v16  ;;  %v1705_v61 = vmul.f32 %v1560_v49, %v1020_v10 }
 0x1b1   : > { %v2395_v6 = vcombine.low %v1698_v44, %v1699_v0  ;;  %v2396_v47 = vcombine.low %v1700_v50, %v1701_v18  ;;  %v1113_v52 = vcombine.low %v510_v5, %v512_v12  ;;  %v1114_v4 = vcombine.high %v510_v5, %v512_v12 }
 0x1b2   : > { %v2341_v46 = vcombine.low %v2331_v60, %v2338_v14  ;;  %v1706_v56 = vmul.f32 %v1562_v3, %v1022_v30  ;;  %v2397_v25 = vcombine.low %v1702_v11, %v1703_v2  ;;  %v2398_v21 = vcombine.low %v1704_v20, %v1705_v61 }
 0x1b3   : > { %v2596_v48 = vsel %vm2515_vm3, %v2299_v54, 0.0  ;;  %v2339_v26 = vcombine.low %v3476_v39, %v2324_v45  ;;  %v2380_v23 = vcombine.high %v3490_v27, %v3490_v27  ;;  %v2412_v16 = vrot.slane %v2396_v47, %v3133_v32 }
 0x1b4   : > { %v3506_v55 = vadd.f32 %v2596_v48, %v2283_v51  ;;  %v2604_v5 = vsel %vm2515_vm3, %v3458_v19, 0.0  ;;  %v2340_v62 = vcombine.high %v3476_v39, %v2324_v45  ;;  %v2419_v10 = vrot.slane %v2397_v25, %v3133_v32 }
 0x1b5   : > { %v2342_v8 = vcombine.high %v2331_v60, %v2338_v14  ;;  %v2405_v63 = vrot.slane %v2395_v6, %v3133_v32  ;;  %v1121_v54 = vrot.slane %v1113_v52, %v3133_v32  ;;  %v1128_v34 = vrot.slane %v1114_v4, %v3133_v32 }
 0x1b6   : > { %v3515_v38 = vadd.f32 %v2604_v5, %v2284_v7  ;;  %v2363_v33 = vrot.slane %v2341_v46, %v3133_v32  ;;  %v2426_v51 = vrot.slane %v2398_v21, %v3133_v32  ;;  %v2467_v30 = vrot.slane %v1706_v56, %v3133_v32 }
 0x1b7   : > { %v2349_v19 = vrot.slane %v2339_v26, %v3133_v32  ;;  %v2387_v39 = vrot.slane %v3490_v27, %v3133_v32  ;;  %v2394_v60 = vrot.slane %v2380_v23, %v3133_v32  ;;  %v2427_v44 = vcombine.low %v2405_v63, %v2412_v16 }
 0x1b8   : > { %v2356_v0 = vrot.slane %v2340_v62, %v3133_v32  ;;  %v2428_v13 = vcombine.high %v2405_v63, %v2412_v16  ;;  %v2429_v49 = vcombine.low %v2419_v10, %v2426_v51  ;;  %v2430_v7 = vcombine.high %v2419_v10, %v2426_v51 }
 0x1b9   : > { %v2370_v40 = vrot.slane %v2342_v8, %v3133_v32  ;;  %v1129_v50 = vcombine.high %v1121_v54, %v1121_v54  ;;  %v1130_v12 = vcombine.high %v1128_v34, %v1128_v34  ;;  %v1137_v21 = vrot.slane %v1121_v54, %v3133_v32 }
 0x1ba   : > { %v2371_v45 = vcombine.low %v2349_v19, %v2363_v33  ;;  %v2468_v14 = vcombine.high %v2467_v30, %v2467_v30  ;;  %v2475_v18 = vrot.slane %v2467_v30, %v3133_v32  ;;  %v1144_v27 = vrot.slane %v1128_v34, %v3133_v32 }
 0x1bb   : > { %v2437_v2 = vrot.slane %v2427_v44, %v3133_v32  ;;  %v1151_v3 = vrot.slane %v1129_v50, %v3133_v32  ;;  %v1158_v11 = vrot.slane %v1130_v12, %v3133_v32  ;;  %v1159_v20 = vcombine.high %v1137_v21, %v1137_v21 }
 0x1bc   : > { %v2444_v61 = vrot.slane %v2428_v13, %v3133_v32  ;;  %v2451_v6 = vrot.slane %v2429_v49, %v3133_v32  ;;  %v2458_v47 = vrot.slane %v2430_v7, %v3133_v32  ;;  %v1160_v52 = vcombine.high %v1144_v27, %v1144_v27 }
 0x1bd   : > { %v1161_v4 = vcombine.high %v1151_v3, %v1151_v3  ;;  %v1162_v46 = vcombine.high %v1158_v11, %v1158_v11  ;;  %v1635_v56 = vmul.f32 %v1137_v21, %v3214_v58  ;;  %v1636_v25 = vmul.f32 %v1151_v3, %v3235_v9 }
 0x1be   : > { %v2482_v48 = vrot.slane %v2468_v14, %v3133_v32  ;;  %v1637_v26 = vmul.f32 %v1159_v20, %v619_v24  ;;  %v1639_v23 = vmul.f32 %v1144_v27, %v3217_v59  ;;  %v1640_v16 = vmul.f32 %v1158_v11, %v3238_v22 }
 0x1bf   : > { %v1638_v5 = vmul.f32 %v1161_v4, %v621_v17  ;;  %v1641_v62 = vmul.f32 %v1160_v52, %v620_v35  ;;  %v3639_v10 = vcombine.high %v3238_v22, %v3238_v22  ;;  %v1779_v63 = vcombine.low %v1635_v56, %v1636_v25 }
 0x1c0   : > { %v2372_v54 = vcombine.low %v2356_v0, %v2370_v40  ;;  %v2459_v58 = vcombine.low %v2437_v2, %v2451_v6  ;;  %v2460_v24 = vcombine.low %v2444_v61, %v2458_v47  ;;  %v1781_v34 = vcombine.low %v1639_v23, %v1640_v16 }
 0x1c1   : > { %v1642_v8 = vmul.f32 %v1162_v46, %v3639_v10  ;;  %v2598_v33 = vrot.slane %v3506_v55, 4  ;;  %v2612_v51 = vsel %vm2515_vm3, %v2387_v39, 0.0  ;;  %v1780_v30 = vcombine.low %v1637_v26, %v1638_v5 }
 0x1c2   : > { %v2613_v17 = vadd.f32 %v2612_v51, %v2371_v45  ;;  %v2620_v19 = vsel %vm2515_vm3, %v2394_v60, 0.0  ;;  %v2628_v59 = vsel %vm2515_vm3, %v2475_v18, 0.0  ;;  %v2636_v35 = vsel %vm2515_vm3, %v2482_v48, 0.0 }
 0x1c3   : > { %v1782_v9 = vcombine.low %v1641_v62, %v1642_v8  ;;  %v1789_v22 = vrot.slane %v1779_v63, %v3133_v32  ;;  %v1796_v44 = vrot.slane %v1780_v30, %v3133_v32  ;;  %v1803_v0 = vrot.slane %v1781_v34, %v3133_v32 }
 0x1c4   : > { %v2606_v49 = vrot.slane %v3515_v38, 4  ;;  %v2621_v39 = vadd.f32 %v2620_v19, %v2372_v54  ;;  %v2629_v7 = vadd.f32 %v2628_v59, %v2459_v58  ;;  %v2637_v40 = vadd.f32 %v2636_v35, %v2460_v24 }
 0x1c5   : > { %v1810_v13 = vrot.slane %v1782_v9, %v3133_v32  ;;  %v1811_v50 = vcombine.low %v1789_v22, %v1796_v44  ;;  %v1812_v12 = vcombine.high %v1789_v22, %v1796_v44  ;;  %v2568_v45 = vrot.slane %v3428_v1, 2 }
 0x1c6   : > { %v2576_v14 = vrot.slane %v3430_v15, 2  ;;  %v2599_v18 = vadd.f32 %v2598_v33, %v3506_v55  ;;  %v2614_v27 = vrot.slane %v2613_v17, 4  ;;  %v2584_v61 = vrot.slane %v3438_v36, 2 }
 0x1c7   : > { %v1813_v60 = vcombine.low %v1803_v0, %v1810_v13  ;;  %v1814_v21 = vcombine.high %v1803_v0, %v1810_v13  ;;  %v1821_v2 = vrot.slane %v1811_v50, %v3133_v32  ;;  %v1828_v3 = vrot.slane %v1812_v12, %v3133_v32 }
 0x1c8   : > { %v2607_v6 = vadd.f32 %v2606_v49, %v3515_v38  ;;  %v2622_v47 = vrot.slane %v2621_v39, 4  ;;  %v2630_v52 = vrot.slane %v2629_v7, 4  ;;  %v2592_v4 = vrot.slane %v3444_v43, 2 }
 0x1c9   : > { %v1835_v11 = vrot.slane %v1813_v60, %v3133_v32  ;;  %v1842_v20 = vrot.slane %v1814_v21, %v3133_v32  ;;  %v2638_v46 = vrot.slane %v2637_v40, 4  ;;  %v2562_v25 = vrot.slane %v3422_v57, 1 }
 0x1ca   : > { %v2569_v48 = vadd.f32 %v2568_v45, %v3428_v1  ;;  %v2600_v26 = vrot.slane %v2599_v18, 2  ;;  %v2615_v23 = vadd.f32 %v2614_v27, %v2613_v17  ;;  %v3640_v32 = vrot.slane %v3417_v53, 1 }
 0x1cb   : > { %v1843_v56 = vcombine.low %v1821_v2, %v1835_v11  ;;  %v1844_v55 = vcombine.low %v1828_v3, %v1842_v20  ;;  %v2577_v5 = vadd.f32 %v2576_v14, %v3430_v15  ;;  %v2585_v10 = vadd.f32 %v2584_v61, %v3438_v36 }
 0x1cc   : > { %v2555_v16 = vadd.f32 %v3640_v32, %v3417_v53  ;;  %v2608_v8 = vrot.slane %v2607_v6, 2  ;;  %v2623_v63 = vadd.f32 %v2622_v47, %v2621_v39  ;;  %v2631_v54 = vadd.f32 %v2630_v52, %v2629_v7 }
 0x1cd   : > { %v2517_v38 = vadd.f32 %v3281_v41, %v1843_v56  ;;  %v2525_v62 = vadd.f32 %v3284_v42, %v1844_v55  ;;  %v2593_v58 = vadd.f32 %v2592_v4, %v3444_v43  ;;  %v2639_v1 = vadd.f32 %v2638_v46, %v2637_v40 }
 0x1ce   : > { %v2563_v33 = vadd.f32 %v2562_v25, %v3422_v57  ;;  %v2570_v51 = vrot.slane %v2569_v48, 1  ;;  %v2601_v53 = vadd.f32 %v2600_v26, %v2599_v18  ;;  %v2616_v30 = vrot.slane %v2615_v23, 2 }
 0x1cf   : > { %v2518_v24 = vrot.slane %v2517_v38, 4  ;;  %v2526_v34 = vrot.slane %v2525_v62, 4  ;;  %v2578_v15 = vrot.slane %v2577_v5, 1  ;;  %v3641_v42 = vrot.slane %v3187_v28, 2 }
 0x1d0   : > { %v2586_v17 = vrot.slane %v2585_v10, 1  ;;  %v2609_v19 = vadd.f32 %v2608_v8, %v2607_v6  ;;  %v2624_v59 = vrot.slane %v2623_v63, 2  ;;  %v2632_v35 = vrot.slane %v2631_v54, 2 }
 0x1d1   : > { %v2519_v9 = vadd.f32 %v2518_v24, %v2517_v38  ;;  %v2527_v41 = vadd.f32 %v2526_v34, %v2525_v62  ;;  %v314_v36 = vadd.f32 %v3641_v42, %v3187_v28  ;;  %v2594_v43 = vrot.slane %v2593_v58, 1 }
 0x1d2   : > { %v2640_v22 = vrot.slane %v2639_v1, 2  ;;  %v2571_v13 = vadd.f32 %v2570_v51, %v2569_v48  ;;  %v2602_v57 = vrot.slane %v2601_v53, 1  ;;  %v2617_v49 = vadd.f32 %v2616_v30, %v2615_v23 }
 0x1d3   : > { %v2520_v44 = vrot.slane %v2519_v9, 2  ;;  %v2528_v0 = vrot.slane %v2527_v41, 2  ;;  %v3642_v39 = vrot.slane %v3184_v37, 2  ;;  %v2579_v40 = vadd.f32 %v2578_v15, %v2577_v5 }
 0x1d4   : > { %v315_v60 = vrot.slane %v314_v36, 1  ;;  %v2587_v28 = vadd.f32 %v2586_v17, %v2585_v10  ;;  %v2610_v21 = vrot.slane %v2609_v19, 1  ;;  %v2625_v45 = vadd.f32 %v2624_v59, %v2623_v63 }
 0x1d5   : > { %v325_v7 = vadd.f32 %v3642_v39, %v3184_v37  ;;  %v2521_v50 = vadd.f32 %v2520_v44, %v2519_v9  ;;  %v2529_v12 = vadd.f32 %v2528_v0, %v2527_v41  ;;  %v2633_v14 = vadd.f32 %v2632_v35, %v2631_v54 }
 0x1d6   : > { %v2595_v18 = vadd.f32 %v2594_v43, %v2593_v58  ;;  %v2641_v3 = vadd.f32 %v2640_v22, %v2639_v1  ;;  %v2603_v11 = vadd.f32 %v2602_v57, %v2601_v53  ;;  %v2618_v20 = vrot.slane %v2617_v49, 1 }
 0x1d7   : > { %v2522_v27 = vrot.slane %v2521_v50, 1  ;;  %v2530_v2 = vrot.slane %v2529_v12, 1  ;;  %v326_v61 = vrot.slane %v325_v7, 1  ;;  %v316_v52 = vadd.f32 %v315_v60, %v314_v36 }
 0x1d8   : > { %v2611_v37 = vadd.f32 %v2610_v21, %v2609_v19  ;;  %v2626_v4 = vrot.slane %v2625_v45, 1  ;;  %v2634_v46 = vrot.slane %v2633_v14, 1  ;;  %v2642_v56 = vrot.slane %v2641_v3, 1 }
 0x1d9   : > { %v2523_v6 = vadd.f32 %v2522_v27, %v2521_v50  ;;  %v2531_v47 = vadd.f32 %v2530_v2, %v2529_v12  ;;  %v327_v48 = vadd.f32 %v326_v61, %v325_v7  ;;  %v2619_v32 = vadd.f32 %v2618_v20, %v2617_v49 }
 0x1da   : > { %v2627_v62 = vadd.f32 %v2626_v4, %v2625_v45  ;;  %v2635_v63 = vadd.f32 %v2634_v46, %v2633_v14  ;;  %v2643_v54 = vadd.f32 %v2642_v56, %v2641_v3 }
 0x1db   : > { %v2661_v55 = vsel %vm2660_vm4, %v3315_v29, %v2523_v6  ;;  %v2674_v25 = vsel %vm2660_vm4, %v3317_v31, %v2531_v47 }
 0x1dc   : > { %v2663_v26 = vsel %vm2662_vm5, %v2555_v16, %v2661_v55  ;;  %v2675_v23 = vsel %vm2662_vm5, %v2563_v33, %v2674_v25 }
 0x1dd   : > { %v2665_v5 = vsel %vm2664_vm6, %v2571_v13, %v2663_v26  ;;  %v2676_v38 = vsel %vm2664_vm6, %v2579_v40, %v2675_v23 }
 0x1de   : > { %v2667_v10 = vsel %vm2666_vm7, %v2587_v28, %v2665_v5  ;;  %v2677_v8 = vsel %vm2666_vm7, %v2595_v18, %v2676_v38 }
 0x1df   : > { %v2669_v58 = vsel %vm2668_vm8, %v2603_v11, %v2667_v10  ;;  %v2678_v29 = vsel %vm2668_vm8, %v2611_v37, %v2677_v8 }
 0x1e0   : > { %v2671_v1 = vsel %vm2670_vm9, %v2619_v32, %v2669_v58  ;;  %v2679_v24 = vsel %vm2670_vm9, %v2627_v62, %v2678_v29 }
 0x1e1   : > { %v2673_v31 = vsel %vm2672_vm10, %v2635_v63, %v2671_v1  ;;  %v2680_v34 = vsel %vm2672_vm10, %v2643_v54, %v2679_v24 }
 0x1e2   : > { %v2683_v16 = vadd.f32 %v2673_v31, %v316_v52  ;;  %v2684_v33 = vadd.f32 %v2680_v34, %v327_v48 }
 0x1e4   : > { %v2685_v51 = vmul.f32 0.027777778, %v2683_v16  ;;  %v2686_v53 = vmul.f32 0.027777778, %v2684_v33 }
 0x1e6   : > { %v2687_v30 = vsub.f32 0.0, %v2685_v51  ;;  %v2688_v15 = vsub.f32 0.0, %v2686_v53 }
 0x1e8   : > { %v2689_v9 = vmul.f32 1.442695, %v2687_v30  ;;  %v2691_v41 = vmul.f32 1.442695, %v2688_v15 }
 0x1ea   : > { %2880 = vpow2.f32 %v2689_v9 }
 0x1eb   : > { %2882 = vpow2.f32 %v2691_v41 }
 0x1f7   : > { %v2881_v42 = vpop.eup %2880 }
 0x1f8   : > { %v2883_v36 = vpop.eup %2882  ;;  %v2807_v17 = vadd.f32 -0.36787945, %v2881_v42 }
 0x1f9   : > { %v2808_v19 = vadd.f32 -0.36787945, %v2883_v36 }
 0x1fa   : > { %v2695_v59 = vmul.f32 1.5819767, %v2807_v17 }
 0x1fb   : > { %v2696_v35 = vmul.f32 1.5819767, %v2808_v19 }
 0x1fc   : > { %v2809_v43 = vadd.f32 -0.5, %v2695_v59 }
 0x1fd   : > { %v2810_v22 = vadd.f32 -0.5, %v2696_v35 }
 0x1fe   : > { %2699 = vst [vmem:[%s193_s5] sm:$0xff] %v2809_v43 }
 0x1ff   : > { %2700 = vst [vmem:[%s193_s5 + $0x8] sm:$0xff] %v2810_v22 }
 0x200   : > { %2897 = shalt.err (!%p2894_p5)
}
 0x201   : > { %s2898_s23 = scalar_lea.hbm %s3597_s14, 256  ;;  %s2902_s25 = scalar_lea.hbm %s3636_s2, 512 }
 0x202   : > { %p2899_p7 = scmp.ne.s32.totalorder %s3597_s14, %s2898_s23  ;;  %p2903_p12 = scmp.lt.s32.totalorder %s3597_s14, %s3636_s2 }
 0x203   : > { %p2904_p13 = scmp.lt.s32.totalorder %s2902_s25, %s2898_s23 }
 0x204   : > { %p2900_p10 = pnand %p2899_p7, %p3002_p6 }
 0x205   : > { %p2905_p0 = por %p2904_p13, %p2903_p12 }
 0x206   : > { %p2901_p11 = pneg %p2900_p10 }
 0x208   : > { %p2906_p1 = pnand %p2905_p0, %p2901_p11 }
 0x20a   : > { %2909 = shalt.err (!%p2906_p1)
}
 0x20b   : > { %2826 = dma.vmem_to_hbm [thread:$0]  (%p3002_p6), %s2717_s6, 256, %s3597_s14, %s2702_s16  }
 0x20c PF: > { %s2728_s29 = sand.u32 1, %s2932_s9   ;;  %p2829_p2 = pnand %p2783_p9, %p3006_p8 }
 0x20d   : > { %s2729_s30 = scalar_lea.sflag [#allocation4], %s2728_s29 }
 0x20e   : > { %p2830_p3 = pneg %p2829_p2 }
 0x210   : > { %2927 = dma.done.wait (%p2830_p3), %s2729_s30, 256  }
 0x211   : > { %2929 = vsyncadd (%p2830_p3), %s2729_s30, 4294967040  ;;  %p12_p4 = scmp.ge.s32.totalorder %s2987_s15, 4   ;;  %s3643_s9 = smov %s2936_s10 }
 0x212   : > { %s3644_s10 = smov %s2940_s11  ;;  %s3645_s11 = smov %s3000_s18 }
 0x213   : > { %s3646_s12 = smov %s2987_s15  ;;  %14 = sbr.rel (!%p12_p4) target bundleno = 3 (0x3), region = 106 }
 0x218   :  { %2734 = vsyncpa [#allocation4], 1 }
 0x219   :  { %2736 = vsyncpa [#allocation4 + $0x1], 1 }

</bundles_post_ra>
